<compile_context>
chip_gen: v7x
topology: tpu7x:2x2x1
jax: 0.10.0
libtpu: 0.0.40
codegen_flags: <defaults>
</compile_context>

<pallas_src>
import jax
import jax.numpy as jnp
from jax.experimental import pallas as pl
from jax.experimental.pallas import tpu as pltpu

HIDDEN = 1024
LEAKY_SLOPE = 0.01        # F.leaky_relu default
TILE_K = 512              # HIDDEN reduction tile -> grid of 2 steps
SUBLANE_PACK = 16         # bf16 sublane packing; pad d to a multiple of this


def _dqn_mlp_kernel(x_ref, w1_ref, b1_ref, w2_ref, b2_ref, out_ref):
    j = pl.program_id(0)

    @pl.when(j == 0)
    def _init():
        # Fold the fc2 bias into the accumulator init (broadcast (1,A)->(B,A)).
        out_ref[...] = jnp.zeros_like(out_ref) + b2_ref[...]

    k0 = pl.multiple_of(j * TILE_K, TILE_K)

    # fc1 chunk: (B, d_pad) @ (d_pad, TILE_K) -> (B, TILE_K), f32 acc on MXU.
    h = jnp.dot(x_ref[...], w1_ref[...], preferred_element_type=jnp.float32)
    h = h + b1_ref[pl.ds(j, 1), :]                 # (1, TILE_K) f32 bias chunk
    h = jnp.where(h > 0, h, LEAKY_SLOPE * h)       # leaky_relu on the VPU

    # fc2 partial: (B, TILE_K) @ (TILE_K, A), accumulated in f32 in out_ref.
    w2_chunk = w2_ref[pl.ds(k0, TILE_K), :]        # VMEM-resident slice
    out_ref[...] += jnp.dot(h.astype(jnp.bfloat16), w2_chunk,
                            preferred_element_type=jnp.float32)


def _pad_last_to_multiple(x, multiple):
    pad = (-x.shape[-1]) % multiple
    if pad == 0:
        return x
    return jnp.pad(x, [(0, 0)] * (x.ndim - 1) + [(0, pad)])


def _pad_first_to_multiple(x, multiple):
    pad = (-x.shape[0]) % multiple
    if pad == 0:
        return x
    return jnp.pad(x, [(0, pad)] + [(0, 0)] * (x.ndim - 1))


def dqn_forward(x, w1, b1, w2, b2):
    """Fused two-layer MLP (fc1 -> leaky_relu -> fc2) as a single Pallas kernel.

    x:  (B, d) f32
    w1: (d, HIDDEN) f32/bf16, b1: (1, HIDDEN) f32
    w2: (HIDDEN, A) f32/bf16, b2: (1, A) f32
    returns: (B, A) f32
    """
    B, d = x.shape
    A = w2.shape[1]
    assert w1.shape == (d, HIDDEN)
    assert HIDDEN % TILE_K == 0
    n_k = HIDDEN // TILE_K

    # Zero-pad d only to a bf16 sublane multiple (exact numerically; a
    # non-multiple-of-128 K just costs one masked partial MXU pass).
    x_p = _pad_last_to_multiple(x, SUBLANE_PACK).astype(jnp.bfloat16)
    w1_p = _pad_first_to_multiple(w1, SUBLANE_PACK).astype(jnp.bfloat16)
    d_pad = x_p.shape[1]

    # Re-layout w1 so each grid step DMAs one contiguous (d_pad, TILE_K) slab.
    # (In a real agent this prep is done once offline, not per forward.)
    w1_slabs = w1_p.reshape(d_pad, n_k, TILE_K).transpose(1, 0, 2)

    b1_r = b1.reshape(HIDDEN).astype(jnp.float32).reshape(n_k, TILE_K)
    w2_b = w2.astype(jnp.bfloat16)
    b2_f = b2.reshape(1, A).astype(jnp.float32)

    flops = 2 * B * (d_pad * HIDDEN + HIDDEN * A)
    bytes_accessed = (x_p.size * 2 + w1_slabs.size * 2 + w2_b.size * 2
                      + b1_r.size * 4 + b2_f.size * 4 + B * A * 4)

    return pl.pallas_call(
        _dqn_mlp_kernel,
        out_shape=jax.ShapeDtypeStruct((B, A), jnp.float32),
        grid_spec=pltpu.PrefetchScalarGridSpec(
            num_scalar_prefetch=0,
            grid=(n_k,),
            in_specs=[
                # x: VMEM-resident across the reduction axis (loaded once).
                pl.BlockSpec((B, d_pad), lambda j: (0, 0)),
                # w1: one contiguous slab per step (leading dim squeezed).
                pl.BlockSpec((None, d_pad, TILE_K), lambda j: (j, 0, 0)),
                # b1 / w2 / b2: loaded once, sliced per step in the kernel.
                pl.BlockSpec((n_k, TILE_K), lambda j: (0, 0)),
                pl.BlockSpec((HIDDEN, A), lambda j: (0, 0)),
                pl.BlockSpec((1, A), lambda j: (0, 0)),
            ],
            out_specs=pl.BlockSpec((B, A), lambda j: (0, 0)),
        ),
        compiler_params=pltpu.CompilerParams(
            dimension_semantics=("arbitrary",),     # reduction axis
            vmem_limit_bytes=16 << 20,
        ),
        cost_estimate=pl.CostEstimate(
            flops=flops, transcendentals=0, bytes_accessed=bytes_accessed),
    )(x_p, w1_slabs, b1_r, w2_b, b2_f)


def init_params(key, input_shape, num_actions):
    """Deterministic parameter init matching the module's shapes.

    fc weights ~ Normal(0, 0.1) as in the PyTorch __init__; biases use the
    same deterministic normal scheme (values are synthetic here anyway).
    """
    channels, height, width = input_shape
    d = channels * height * width + 4
    k1, k2, k3, k4 = jax.random.split(key, 4)
    w1 = 0.1 * jax.random.normal(k1, (d, HIDDEN), dtype=jnp.float32)
    b1 = 0.1 * jax.random.normal(k2, (1, HIDDEN), dtype=jnp.float32)
    w2 = 0.1 * jax.random.normal(k3, (HIDDEN, num_actions), dtype=jnp.float32)
    b2 = 0.1 * jax.random.normal(k4, (1, num_actions), dtype=jnp.float32)
    return w1, b1, w2, b2


if __name__ == "__main__":
    key = jax.random.PRNGKey(0)

    # Small shapes consistent with the module: frame (C=4, H=16, W=16), +4 extras.
    input_shape = (4, 16, 16)
    num_actions = 8
    batch = 2
    d = input_shape[0] * input_shape[1] * input_shape[2] + 4   # 1028

    k_x, k_p = jax.random.split(key)
    x = jax.random.normal(k_x, (batch, d), dtype=jnp.float32)
    w1, b1, w2, b2 = init_params(k_p, input_shape, num_actions)

    out = dqn_forward(x, w1, b1, w2, b2)
    out = jax.block_until_ready(out)
    assert out.shape == (batch, num_actions)

    # Reference check with the same bf16 rounding the kernel uses (remaining
    # kernel-vs-reference difference is only f32 accumulation order in fc2).
    xb = x.astype(jnp.bfloat16)
    w1_b = w1.astype(jnp.bfloat16)
    w2_b = w2.astype(jnp.bfloat16)
    h_ref = jnp.dot(xb, w1_b, preferred_element_type=jnp.float32) + b1
    h_ref = jnp.where(h_ref > 0, h_ref, LEAKY_SLOPE * h_ref)
    ref = jnp.dot(h_ref.astype(jnp.bfloat16), w2_b,
                  preferred_element_type=jnp.float32) + b2
    assert jnp.allclose(out, ref, atol=1e-2, rtol=1e-2)

    # Loose sanity check against the pure-f32 PyTorch-equivalent math
    # (bf16 quantization introduces small, DQN-tolerable error).
    h_f32 = x @ w1 + b1
    h_f32 = jnp.where(h_f32 > 0, h_f32, LEAKY_SLOPE * h_f32)
    ref_f32 = h_f32 @ w2 + b2
    assert jnp.allclose(out, ref_f32, atol=0.5, rtol=0.1)

    print("KERNEL_OK")
</pallas_src>

<mosaic_0001>
module attributes {stable_mosaic.version = 11 : i64} {
  func.func @_dqn_mlp_kernel(%arg0: i32, %arg1: memref<2x1040xbf16, #tpu.memory_space<vmem>>, %arg2: memref<1x1040x512xbf16, #tpu.memory_space<vmem>>, %arg3: memref<2x512xf32, #tpu.memory_space<vmem>>, %arg4: memref<1024x8xbf16, #tpu.memory_space<vmem>>, %arg5: memref<1x8xf32, #tpu.memory_space<vmem>>, %arg6: memref<2x8xf32, #tpu.memory_space<vmem>>) attributes {dimension_semantics = [#tpu.dimension_semantics<arbitrary>], iteration_bounds = array<i64: 2>, scalar_prefetch = 0 : i64, scratch_operands = 0 : i64, tpu.core_type = #tpu.core_type<tc>, window_params = [{pipeline_mode = #tpu.pipeline_mode<synchronous>, transform_indices = @transform_0, window_bounds = array<i64: 2, 1040>}, {transform_indices = @transform_1, window_bounds = array<i64: 1, 1040, 512>}, {pipeline_mode = #tpu.pipeline_mode<synchronous>, transform_indices = @transform_2, window_bounds = array<i64: 2, 512>}, {pipeline_mode = #tpu.pipeline_mode<synchronous>, transform_indices = @transform_3, window_bounds = array<i64: 1024, 8>}, {pipeline_mode = #tpu.pipeline_mode<synchronous>, transform_indices = @transform_4, window_bounds = array<i64: 1, 8>}, {pipeline_mode = #tpu.pipeline_mode<synchronous>, transform_indices = @transform_5, window_bounds = array<i64: 2, 8>}]} {
    %c0_i32 = arith.constant 0 : i32
    %0 = arith.cmpi eq, %arg0, %c0_i32 : i32
    %1 = arith.extui %0 : i1 to i32
    %c0_i32_0 = arith.constant 0 : i32
    %2 = arith.cmpi ne, %1, %c0_i32_0 : i32
    scf.if %2 {
      %cst_14 = arith.constant 0.000000e+00 : f32
      %25 = vector.broadcast %cst_14 : f32 to vector<2x8xf32>
      %c0_15 = arith.constant 0 : index
      %c0_16 = arith.constant 0 : index
      %26 = vector.load %arg5[%c0_15, %c0_16] : memref<1x8xf32, #tpu.memory_space<vmem>>, vector<1x8xf32>
      %27 = vector.broadcast %26 : vector<1x8xf32> to vector<2x8xf32>
      %28 = arith.addf %25, %27 : vector<2x8xf32>
      %c0_17 = arith.constant 0 : index
      %c0_18 = arith.constant 0 : index
      %29 = vector.load %arg6[%c0_17, %c0_18] : memref<2x8xf32, #tpu.memory_space<vmem>>, vector<2x8xf32>
      tpu.vector_store %arg6[%c0_17, %c0_18], %28 {strides = array<i32>} : memref<2x8xf32, #tpu.memory_space<vmem>>, vector<2x8xf32>,
    } else {
    }
    %c512_i32 = arith.constant 512 : i32
    %3 = arith.muli %arg0, %c512_i32 : i32
    %4 = tpu.assume_multiple %3, 512 : i32
    %c0 = arith.constant 0 : index
    %c0_1 = arith.constant 0 : index
    %5 = vector.load %arg1[%c0, %c0_1] : memref<2x1040xbf16, #tpu.memory_space<vmem>>, vector<2x1040xbf16>
    %c0_2 = arith.constant 0 : index
    %c0_3 = arith.constant 0 : index
    %c0_4 = arith.constant 0 : index
    %6 = vector.load %arg2[%c0_2, %c0_3, %c0_4] : memref<1x1040x512xbf16, #tpu.memory_space<vmem>>, vector<1x1040x512xbf16>
    %7 = vector.shape_cast %6 : vector<1x1040x512xbf16> to vector<1040x512xbf16>
    %cst = arith.constant dense<0.000000e+00> : vector<2x512xf32>
    %8 = tpu.matmul %5, %7, %cst {dimension_numbers = #tpu.dot_dimension_numbers<[1], [0], [0], [1], [0, 0, 1, 1], [], []>} : vector<2x1040xbf16>, vector<1040x512xbf16>, vector<2x512xf32> -> vector<2x512xf32>
    %9 = arith.index_cast %arg0 : i32 to index
    %c0_5 = arith.constant 0 : index
    %10 = vector.load %arg3[%9, %c0_5] : memref<2x512xf32, #tpu.memory_space<vmem>>, vector<1x512xf32>
    %11 = vector.broadcast %10 : vector<1x512xf32> to vector<2x512xf32>
    %12 = arith.addf %8, %11 : vector<2x512xf32>
    %cst_6 = arith.constant 0.000000e+00 : f32
    %13 = vector.broadcast %cst_6 : f32 to vector<2x512xf32>
    %14 = arith.cmpf ogt, %12, %13 : vector<2x512xf32>
    %cst_7 = arith.constant 0.00999999977 : f32
    %15 = vector.broadcast %cst_7 : f32 to vector<2x512xf32>
    %16 = arith.mulf %15, %12 : vector<2x512xf32>
    %17 = arith.select %14, %12, %16 : vector<2x512xi1>, vector<2x512xf32>
    %18 = arith.index_cast %4 : i32 to index
    %c0_8 = arith.constant 0 : index
    %19 = vector.load %arg4[%18, %c0_8] : memref<1024x8xbf16, #tpu.memory_space<vmem>>, vector<512x8xbf16>
    %c0_9 = arith.constant 0 : index
    %c0_10 = arith.constant 0 : index
    %20 = vector.load %arg6[%c0_9, %c0_10] : memref<2x8xf32, #tpu.memory_space<vmem>>, vector<2x8xf32>
    %21 = arith.truncf %17 : vector<2x512xf32> to vector<2x512xbf16>
    %cst_11 = arith.constant dense<0.000000e+00> : vector<2x8xf32>
    %22 = tpu.matmul %21, %19, %cst_11 {dimension_numbers = #tpu.dot_dimension_numbers<[1], [0], [0], [1], [0, 0, 1, 1], [], []>} : vector<2x512xbf16>, vector<512x8xbf16>, vector<2x8xf32> -> vector<2x8xf32>
    %23 = arith.addf %20, %22 : vector<2x8xf32>
    %c0_12 = arith.constant 0 : index
    %c0_13 = arith.constant 0 : index
    %24 = vector.load %arg6[%c0_12, %c0_13] : memref<2x8xf32, #tpu.memory_space<vmem>>, vector<2x8xf32>
    tpu.vector_store %arg6[%c0_12, %c0_13], %23 {strides = array<i32>} : memref<2x8xf32, #tpu.memory_space<vmem>>, vector<2x8xf32>,
    return
  }
  func.func @transform_0(%arg0: i32) -> (i32, i32) {
    %c0_i32 = arith.constant 0 : i32
    %c0_i32_0 = arith.constant 0 : i32
    %c0_i32_1 = arith.constant 0 : i32
    return %c0_i32, %c0_i32_0 : i32, i32
  }
  func.func @transform_1(%arg0: i32) -> (i32, i32, i32) {
    %c0_i32 = arith.constant 0 : i32
    %c0_i32_0 = arith.constant 0 : i32
    %c0_i32_1 = arith.constant 0 : i32
    return %arg0, %c0_i32, %c0_i32_0 : i32, i32, i32
  }
  func.func @transform_2(%arg0: i32) -> (i32, i32) {
    %c0_i32 = arith.constant 0 : i32
    %c0_i32_0 = arith.constant 0 : i32
    %c0_i32_1 = arith.constant 0 : i32
    return %c0_i32, %c0_i32_0 : i32, i32
  }
  func.func @transform_3(%arg0: i32) -> (i32, i32) {
    %c0_i32 = arith.constant 0 : i32
    %c0_i32_0 = arith.constant 0 : i32
    %c0_i32_1 = arith.constant 0 : i32
    return %c0_i32, %c0_i32_0 : i32, i32
  }
  func.func @transform_4(%arg0: i32) -> (i32, i32) {
    %c0_i32 = arith.constant 0 : i32
    %c0_i32_0 = arith.constant 0 : i32
    %c0_i32_1 = arith.constant 0 : i32
    return %c0_i32, %c0_i32_0 : i32, i32
  }
  func.func @transform_5(%arg0: i32) -> (i32, i32) {
    %c0_i32 = arith.constant 0 : i32
    %c0_i32_0 = arith.constant 0 : i32
    %c0_i32_1 = arith.constant 0 : i32
    return %c0_i32, %c0_i32_0 : i32, i32
  }
}

</mosaic_0001>

<bundles_post_ra>
// kernel: tpu_custom_call.1
= control target key start
LH: loop header
LB: loop body
LE: loop exit
PB: predicated region body
PF: predicated region fallthrough
CT: control target
= control target key end

     0   :  { %10 = vsyncpa [#allocation3], 0  ;;  %s4532_s0 = inlined_call_operand.hbm [shape: bf16[2,1040], index: 0, kind: input, shape index: {}]   ;;  %s4533_s1 = inlined_call_operand.hbm [shape: bf16[2,1040,512], index: 1, kind: input, shape index: {}]   ;;  %s4534_s2 = inlined_call_operand.hbm [shape: f32[2,512], index: 2, kind: input, shape index: {}]   ;;  %s4535_s3 = inlined_call_operand.vmem [shape: bf16[1024,8], index: 3, kind: input, shape index: {}]   ;;  %s4536_s4 = inlined_call_operand.hbm [shape: f32[1,8], index: 4, kind: input, shape index: {}]   ;;  %s4537_s5 = inlined_call_operand.hbm [shape: f32[2,8], index: 5, kind: output, shape index: {}]  }
   0x1   :  { %11 = vsyncpa [#allocation6], 0 }
   0x2   :  { %13 = vsyncpa [#allocation6 + $0x1], 0 }
   0x3   :  { %14 = vsyncpa [#allocation9], 0 }
   0x4   :  { %15 = vsyncpa [#allocation4], 0  ;;  %s3952_s18 = smov 0   ;;  %s3954_s19 = smov 0  }
   0x5   :  { %s3956_s20 = smov 0   ;;  %s3958_s21 = smov 0  }
   0x6 LB: > { %s3971_s22 = sadd.s32 4294967295, %s3911_s21   ;;  %s3974_s23 = sadd.s32 1, %s3911_s21   ;;  %s3911_s21 = sphi %s3958_s21, %s4561_s21   ;;  %s3907_s20 = sphi %s3956_s20, %s4560_s20   ;;  %s3903_s19 = sphi %s3954_s19, %s4559_s19   ;;  %s3899_s18 = sphi %s3952_s18, %s4558_s18  }
   0x7   : > { %s46_s24 = ssub.s32 %s3911_s21, %s3974_s23  ;;  %s49_s25 = sadd.s32 1, %s3907_s20 }
   0x8   : > { %p47_p0 = scmp.eq.s32.totalorder %s46_s24, 0  ;;  %p56_p1 = scmp.ne.s32.totalorder %s3907_s20, %s3903_s19 }
   0x9   : > { %p57_p2 = scmp.eq.s32.totalorder %s3911_s21, 0  ;;  %p62_p3 = scmp.ne.s32.totalorder %s3903_s19, %s3899_s18 }
   0xa   : > { %s3984_s26 = scalar_select %p47_p0, %s3907_s20, %s49_s25  }
   0xb   : > { %p3986_p4 = por %p57_p2, %p56_p1  ;;  %p4538_p5 = scmp.eq.s32.totalorder %s3971_s22, 0 }
   0xc   : > { %p2818_p6 = scmp.ge.s32.totalorder %s3911_s21, 1  ;;  %p157_p7 = scmp.lt.s32.totalorder %s3911_s21, 3 }
   0xd   : > { %p3995_p8 = por %p4538_p5, %p62_p3  ;;  %s3913_s30 = smov [#allocation7]  }
   0xe   : > { %p4000_p10 = pnand %p2818_p6, %p157_p7  ;;  %s181_s6 = sshll.u32 %s3913_s30, 4  ;;  %s182_s6 = int_to_ptr.vmem [resolvable:$true] %s181_s6 }
   0xf   : > { %s4543_s28 = scalar_select %p3995_p8, 1, 0 }
  0x10   : > { %s4544_s29 = scalar_select %p4000_p10, 1, 0 }
  0x11   : > { %p3235_p11 = pneg %p4000_p10  ;;  %p3252_p12 = scmp.lt.s32.totalorder %s3911_s21, 2 }
  0x12   : > { %s3914_s8 = smov [#allocation2]   ;;  %s3721_s13 = scalar_lea.hbm %s4534_s2, 128 }
  0x13   : > { %p4009_p13 = pnand %p3235_p11, %p4538_p5  ;;  %s170_s9 = sshll.u32 %s3914_s8, 4  ;;  %s4019_s9 = int_to_ptr.vmem [resolvable:$true] %s170_s9 }
  0x14   : > { %p4015_p0 = pnand %p3252_p12, %p3986_p4  ;;  %p3722_p1 = scmp.ne.s32.totalorder %s4534_s2, %s3721_s13 }
  0x15   : > { %p4029_p2 = pneg %p4009_p13  ;;  %p3728_p6 = scmp.lt.u32.totalorder %s3721_s13, %s4534_s2 }
  0x16   : > { %s4546_s10 = scalar_select %p4015_p0, 1, 0 }
  0x17   : > { %p3724_p3 = pnand %p4029_p2, %p3722_p1 }
  0x19   : > { %p3725_p4 = pneg %p3724_p3 }
  0x1b   : > { %p3730_p7 = pnand %p3728_p6, %p3725_p4 }
  0x1d   : > { %3733 = shalt.err (!%p3730_p7)
}
  0x1e   : > { %s3734_s24 = scalar_lea.vmem %s182_s6, 128  ;;  %p3742_p5 = scmp.lt.s32.totalorder %s182_s6, %s182_s6 }
  0x1f   : > { %p3735_p11 = scmp.ne.s32.totalorder %s182_s6, %s3734_s24  ;;  %p3743_p8 = scmp.lt.s32.totalorder %s3734_s24, %s3734_s24 }
  0x21   : > { %p3737_p12 = pnand %p3735_p11, %p4029_p2  ;;  %p3744_p10 = por %p3743_p8, %p3742_p5 }
  0x23   : > { %p3738_p9 = pneg %p3737_p12 }
  0x25   : > { %p3745_p0 = pnand %p3744_p10, %p3738_p9 }
  0x27   : > { %3748 = shalt.err (!%p3745_p0)
}
  0x28   : > { %3241 = dma.hbm_to_vmem [thread:$0]  (!%p4009_p13), %s4534_s2, 128, %s182_s6, [#allocation6]  }
  0x29   : > { %s3915_s30 = smov [#allocation8]   ;;  %s3749_s13 = scalar_lea.hbm %s4532_s0, 144 }
  0x2a   : > { %s195_s8 = sshll.u32 %s3915_s30, 4  ;;  %p3750_p1 = scmp.ne.s32.totalorder %s4532_s0, %s3749_s13  ;;  %s196_s8 = int_to_ptr.vmem [resolvable:$true] %s195_s8 }
  0x2b   : > { %p3756_p9 = scmp.lt.u32.totalorder %s3749_s13, %s4532_s0 }
  0x2c   : > { %p3752_p5 = pnand %p3750_p1, %p4029_p2 }
  0x2e   : > { %p3753_p8 = pneg %p3752_p5 }
  0x30   : > { %p3758_p10 = pnand %p3756_p9, %p3753_p8 }
  0x32   : > { %3761 = shalt.err (!%p3758_p10)
}
  0x33   : > { %s3762_s6 = scalar_lea.vmem %s4019_s9, 144  ;;  %s3769_s24 = scalar_lea.vmem %s4019_s9, 160 }
  0x34   : > { %p3763_p0 = scmp.ne.s32.totalorder %s4019_s9, %s3762_s6  ;;  %p3770_p6 = scmp.lt.s32.totalorder %s4019_s9, %s4019_s9 }
  0x35   : > { %p3771_p7 = scmp.lt.s32.totalorder %s3769_s24, %s3762_s6 }
  0x36   : > { %p3765_p3 = pnand %p3763_p0, %p4029_p2 }
  0x37   : > { %p3772_p11 = por %p3771_p7, %p3770_p6 }
  0x38   : > { %p3766_p4 = pneg %p3765_p3 }
  0x3a   : > { %p3773_p12 = pnand %p3772_p11, %p3766_p4 }
  0x3c   : > { %3776 = shalt.err (!%p3773_p12)
}
  0x3d   : > { %3238 = dma.hbm_to_vmem [thread:$0]  (!%p4009_p13), %s4532_s0, 144, %s4019_s9, [#allocation3]  }
  0x3e   : > { %s206_s30 = sand.u32 1, %s3911_s21   ;;  %s3777_s13 = scalar_lea.hbm %s4536_s4, 16 }
  0x3f   : > { %p3778_p1 = scmp.ne.s32.totalorder %s4536_s4, %s3777_s13  ;;  %p3784_p9 = scmp.lt.u32.totalorder %s3777_s13, %s4536_s4 }
  0x41   : > { %p3780_p5 = pnand %p3778_p1, %p4029_p2 }
  0x43   : > { %p3781_p8 = pneg %p3780_p5 }
  0x45   : > { %p3786_p10 = pnand %p3784_p9, %p3781_p8 }
  0x47   : > { %3789 = shalt.err (!%p3786_p10)
}
  0x48   : > { %s3790_s9 = scalar_lea.vmem %s196_s8, 16  ;;  %s3797_s6 = scalar_lea.vmem %s196_s8, 32 }
  0x49   : > { %p3791_p0 = scmp.ne.s32.totalorder %s196_s8, %s3790_s9  ;;  %p3798_p6 = scmp.lt.s32.totalorder %s196_s8, %s196_s8 }
  0x4a   : > { %p3799_p7 = scmp.lt.s32.totalorder %s3797_s6, %s3790_s9 }
  0x4b   : > { %p3793_p3 = pnand %p3791_p0, %p4029_p2 }
  0x4c   : > { %p3800_p11 = por %p3799_p7, %p3798_p6 }
  0x4d   : > { %p3794_p4 = pneg %p3793_p3 }
  0x4f   : > { %p3801_p12 = pnand %p3800_p11, %p3794_p4 }
  0x51   : > { %3804 = shalt.err (!%p3801_p12)
}
  0x52   : > { %3244 = dma.hbm_to_vmem [thread:$0]  (!%p4009_p13), %s4536_s4, 16, %s196_s8, [#allocation9]  }
  0x53   : > { %s208_s27 = sand.u32 1, %s3907_s20   ;;  %s3215_s11 = smul.u32 33280, %s3911_s21 }
  0x54   : > { %s3214_s16 = smul.u32 2080, %s208_s27  ;;  %s4097_s17 = scalar_lea.sflag [#allocation6], %s206_s30 }
  0x55   : > { %s4093_s14 = scalar_lea.hbm %s4533_s1, %s3215_s11  ;;  %p4548_p2 = scmp.ne.s32.totalorder %s4546_s10, 0 }
  0x56   : > { %s210_s7 = scalar_lea.vmem [#allocation5], %s3214_s16  ;;  %s3805_s18 = scalar_lea.hbm %s4093_s14, 33280 }
  0x57   : > { %s217_s15 = sshll.u32 %s210_s7, 4  ;;  %p3806_p13 = scmp.ne.s32.totalorder %s4093_s14, %s3805_s18  ;;  %s4095_s15 = int_to_ptr.vmem [resolvable:$true] %s217_s15 }
  0x58   : > { %p3807_p1 = pneg %p4548_p2  ;;  %s3810_s9 = scalar_lea.hbm %s4533_s1, 66560 }
  0x59   : > { %p3811_p9 = scmp.lt.u32.totalorder %s4093_s14, %s4533_s1  ;;  %p3812_p10 = scmp.lt.u32.totalorder %s3810_s9, %s3805_s18 }
  0x5a   : > { %p3808_p5 = pnand %p3807_p1, %p3806_p13  ;;  %p3814_p3 = scmp.lt.u32.totalorder %s3805_s18, %s4093_s14 }
  0x5b   : > { %p3813_p0 = por %p3812_p10, %p3811_p9 }
  0x5c   : > { %p3809_p8 = pneg %p3808_p5 }
  0x5d   : > { %p3815_p4 = por %p3814_p3, %p3813_p0 }
  0x5f   : > { %p3816_p6 = pnand %p3815_p4, %p3809_p8 }
  0x61   : > { %3819 = shalt.err (!%p3816_p6)
}
  0x62   : > { %s3820_s30 = scalar_lea.vmem %s4095_s15, 33280  ;;  %s3916_s25 = smov [#allocation5]  }
  0x63   : > { %p3821_p7 = scmp.ne.s32.totalorder %s4095_s15, %s3820_s30  ;;  %s3825_s27 = sshll.u32 %s3916_s25, 4  ;;  %s3826_s27 = int_to_ptr.vmem [resolvable:$false] %s3825_s27 }
  0x64   : > { %s3827_s16 = scalar_lea.vmem %s3826_s27, 66560  ;;  %p3828_p13 = scmp.lt.s32.totalorder %s4095_s15, %s3826_s27 }
  0x65   : > { %p3823_p11 = pnand %p3821_p7, %p3807_p1  ;;  %p3829_p5 = scmp.lt.s32.totalorder %s3827_s16, %s3820_s30 }
  0x67   : > { %p3824_p12 = pneg %p3823_p11  ;;  %p3830_p9 = por %p3829_p5, %p3828_p13 }
  0x69   : > { %p3831_p10 = pnand %p3830_p9, %p3824_p12 }
  0x6b   : > { %3834 = shalt.err (!%p3831_p10)
}
  0x6c   : > { %s3917_s11 = smov 256   ;;  %s3918_s12 = smov 16  }
  0x6d   : > { %3248 = dma.hbm_to_vmem [thread:$0]  (!%p4548_p2), %s4093_s14, 33280, %s4095_s15, %s4097_s17, %s3917_s11, %s3917_s11, %s3918_s12  }
  0x6e   : > { %p4549_p1 = scmp.ne.s32.totalorder %s4544_s29, 0 }
  0x6f   : > { %p4550_p8 = scmp.eq.s32.totalorder (!%p4549_p1), %s3971_s22, 0 }
  0x70   : > { %229 = sbr.rel (%p4549_p1) target bundleno = 864 (0x360), region = 40 }
  0x77   : > { %3878 = dma.done.wait (%p4550_p8), [#allocation3], 144   ;;  %p4551_p0 = pmov %p4550_p8 }
  0x78   : > { %s235_s13 = sand.u32 1, %s3971_s22   ;;  %s237_s7 = sand.u32 1, %s3903_s19  }
  0x79   : > { %3880 = vsyncadd (%p4551_p0), [#allocation3], 4294967152  ;;  %s3216_s18 = smul.u32 2080, %s237_s7  ;;  %s236_s21 = scalar_lea.sflag [#allocation6], %s235_s13 }
  0x7a   : > { %p4552_p2 = scmp.ne.s32.totalorder %s4543_s28, 0 }
  0x7b   : > { %s4135_s10 = scalar_lea.vmem [#allocation5], %s3216_s18 }
  0x7c   : > { %3882 = dma.done.wait (%p4552_p2), %s236_s21, 33280  }
  0x7d   : > { %3884 = vsyncadd (%p4552_p2), %s236_s21, 4294934016  ;;  %p4553_p3 = pmov %p4551_p0 }
  0x7e   : > { %p4554_p4 = pmov %p4551_p0 }
  0x7f   : > { %3886 = dma.done.wait (%p4553_p3), [#allocation6], 128  }
  0x80   : > { %3888 = vsyncadd (%p4554_p4), [#allocation6], 4294967168  ;;  %p4555_p6 = pmov %p4551_p0 }
  0x81   : > { %p4556_p7 = pmov %p4551_p0 }
  0x82   : > { %3890 = dma.done.wait (%p4555_p6), [#allocation9], 16  }
  0x83   : > { %3892 = vsyncadd (%p4556_p7), [#allocation9], 4294967280  ;;  %p4557_p11 = scmp.ne.s32.totalorder %s3971_s22, 0 }
  0x84   : > { %v2829_v0 = vld [vmem:[#allocation8] ss:$0 sm:$0xff] (!%p4557_p11)  ;;  %vm282_vm0 = vcmask (!%p4557_p11), 58368  }
  0x85   : > { %273 = sbr.rel (%p4557_p11) target bundleno = 140 (0x8c), region = 60  ;;  %283 = vst.msk [vmem:[#allocation10] sm:$0x3] (!%p4557_p11), %vm282_vm0, %v2829_v0 }
  0x8c PF: > { %v3298_v1 = vld [vmem:[%s4135_s10 + $0x4] ss:$16 sps:$4 sm:$0xff]   ;;  %v3300_v2 = vld [vmem:[%s4135_s10 + $0xc] ss:$16 sps:$4 sm:$0xff]   ;;  %v3302_v3 = vld [vmem:[%s4135_s10] ss:$16 sps:$4 sm:$0xff]   ;;  %v557_v37 = vlaneseq }
  0x8d   : > { %1954 = vmatprep.subr.bf16.mxu0 %v3298_v1  ;;  %v3303_v4 = vld [vmem:[%s4135_s10 + $0x8] ss:$16 sps:$4 sm:$0xff]   ;;  %2159 = vmatprep.subr.bf16.mxu1 %v3300_v2  ;;  %v3304_v5 = vld [vmem:[%s4135_s10 + $0x24] ss:$16 sps:$4 sm:$0xff]   ;;  %v3306_v6 = vld [vmem:[%s4135_s10 + $0x2c] ss:$16 sps:$4 sm:$0xff]  }
  0x8e   : > { %1955 = vmatpush1.bf16.msra.mxu0 %v3302_v3  ;;  %2160 = vmatpush1.bf16.msra.mxu1 %v3303_v4  ;;  %v3308_v7 = vld [vmem:[%s4135_s10 + $0x20] ss:$16 sps:$4 sm:$0xff]   ;;  %v3309_v8 = vld [vmem:[%s4135_s10 + $0x28] ss:$16 sps:$4 sm:$0xff]   ;;  %v3310_v9 = vld [vmem:[%s4135_s10 + $0x44] ss:$16 sps:$4 sm:$0xff]  }
  0x8f   : > { %1956 = vmatprep.subr.bf16.mxu0 %v3304_v5  ;;  %2161 = vmatprep.subr.bf16.mxu1 %v3306_v6  ;;  %v3312_v10 = vld [vmem:[%s4135_s10 + $0x4c] ss:$16 sps:$4 sm:$0xff]   ;;  %v3314_v11 = vld [vmem:[%s4135_s10 + $0x40] ss:$16 sps:$4 sm:$0xff]   ;;  %v3315_v12 = vld [vmem:[%s4135_s10 + $0x48] ss:$16 sps:$4 sm:$0xff]  }
  0x90   : > { %v3316_v13 = vld [vmem:[%s4135_s10 + $0x64] ss:$16 sps:$4 sm:$0xff]   ;;  %v3318_v14 = vld [vmem:[%s4135_s10 + $0x6c] ss:$16 sps:$4 sm:$0xff]   ;;  %v3320_v15 = vld [vmem:[%s4135_s10 + $0x60] ss:$16 sps:$4 sm:$0xff]  }
  0x91   : > { %v3321_v16 = vld [vmem:[%s4135_s10 + $0x68] ss:$16 sps:$4 sm:$0xff]   ;;  %v3322_v17 = vld [vmem:[%s4135_s10 + $0x84] ss:$16 sps:$4 sm:$0xff]   ;;  %v3324_v18 = vld [vmem:[%s4135_s10 + $0x8c] ss:$16 sps:$4 sm:$0xff]  }
  0x92   : > { %1957 = vmatpush1.bf16.msra.mxu0 %v3308_v7  ;;  %2162 = vmatpush1.bf16.msra.mxu1 %v3309_v8  ;;  %v3326_v19 = vld [vmem:[%s4135_s10 + $0x80] ss:$16 sps:$4 sm:$0xff]   ;;  %v3327_v20 = vld [vmem:[%s4135_s10 + $0x88] ss:$16 sps:$4 sm:$0xff]   ;;  %v3328_v21 = vld [vmem:[%s4135_s10 + $0xa4] ss:$16 sps:$4 sm:$0xff]  }
  0x93   : > { %1958 = vmatprep.subr.bf16.mxu0 %v3310_v9  ;;  %2163 = vmatprep.subr.bf16.mxu1 %v3312_v10  ;;  %v3330_v22 = vld [vmem:[%s4135_s10 + $0xac] ss:$16 sps:$4 sm:$0xff]   ;;  %v3332_v23 = vld [vmem:[%s4135_s10 + $0xa0] ss:$16 sps:$4 sm:$0xff]   ;;  %v3333_v24 = vld [vmem:[%s4135_s10 + $0xa8] ss:$16 sps:$4 sm:$0xff]  }
  0x94   : > { %v3334_v25 = vld [vmem:[%s4135_s10 + $0xc4] ss:$16 sps:$4 sm:$0xff]   ;;  %v3336_v26 = vld [vmem:[%s4135_s10 + $0xcc] ss:$16 sps:$4 sm:$0xff]   ;;  %v3338_v27 = vld [vmem:[%s4135_s10 + $0xc0] ss:$16 sps:$4 sm:$0xff]  }
  0x95   : > { %v3339_v28 = vld [vmem:[%s4135_s10 + $0xc8] ss:$16 sps:$4 sm:$0xff]   ;;  %v3340_v29 = vld [vmem:[%s4135_s10 + $0xe4] ss:$16 sps:$4 sm:$0xff]   ;;  %v3342_v30 = vld [vmem:[%s4135_s10 + $0xec] ss:$16 sps:$4 sm:$0xff]  }
  0x96   : > { %1959 = vmatpush1.bf16.msra.mxu0 %v3314_v11  ;;  %2164 = vmatpush1.bf16.msra.mxu1 %v3315_v12  ;;  %v3344_v31 = vld [vmem:[%s4135_s10 + $0xe0] ss:$16 sps:$4 sm:$0xff]   ;;  %v3345_v32 = vld [vmem:[%s4135_s10 + $0xe8] ss:$16 sps:$4 sm:$0xff]   ;;  %v3346_v33 = vld [vmem:[%s4135_s10 + $0x104] ss:$16 sps:$4 sm:$0xff]  }
  0x97   : > { %1960 = vmatprep.subr.bf16.mxu0 %v3316_v13  ;;  %2165 = vmatprep.subr.bf16.mxu1 %v3318_v14  ;;  %v3348_v34 = vld [vmem:[%s4135_s10 + $0x10c] ss:$16 sps:$4 sm:$0xff]   ;;  %v3350_v35 = vld [vmem:[%s4135_s10 + $0x100] ss:$16 sps:$4 sm:$0xff]   ;;  %v3351_v36 = vld [vmem:[%s4135_s10 + $0x108] ss:$16 sps:$4 sm:$0xff]  }
  0x98   : > { %v3919_v38 = vmov 1966171168   ;;  %v3352_v40 = vld [vmem:[%s4135_s10 + $0x124] ss:$16 sps:$4 sm:$0xff]   ;;  %v3354_v41 = vld [vmem:[%s4135_s10 + $0x12c] ss:$16 sps:$4 sm:$0xff]  }
  0x99   : > { %v581_v39 = vunpack.c.l.s4 %v3919_v38  ;;  %v3356_v42 = vld [vmem:[%s4135_s10 + $0x120] ss:$16 sps:$4 sm:$0xff]   ;;  %v4190_v43 = vshrl.u32 %v557_v37, 7  ;;  %v3357_v45 = vld [vmem:[%s4135_s10 + $0x128] ss:$16 sps:$4 sm:$0xff]   ;;  %s2830_s28 = sshll.u32 %s3971_s22, 9 }
  0x9a   : > { %1961 = vmatpush1.bf16.msra.mxu0 %v3320_v15  ;;  %2166 = vmatpush1.bf16.msra.mxu1 %v3321_v16  ;;  %v3358_v46 = vld [vmem:[%s4135_s10 + $0x144] ss:$16 sps:$4 sm:$0xff]   ;;  %v3360_v47 = vld [vmem:[%s4135_s10 + $0x14c] ss:$16 sps:$4 sm:$0xff]   ;;  %v3362_v48 = vld [vmem:[%s4135_s10 + $0x140] ss:$16 sps:$4 sm:$0xff]  }
  0x9b   : > { %1962 = vmatprep.subr.bf16.mxu0 %v3322_v17  ;;  %2167 = vmatprep.subr.bf16.mxu1 %v3324_v18  ;;  %v582_v44 = vunpack.c.0.s8 %v581_v39  ;;  %v3363_v49 = vld [vmem:[%s4135_s10 + $0x148] ss:$16 sps:$4 sm:$0xff]   ;;  %v3364_v51 = vld [vmem:[%s4135_s10 + $0x164] ss:$16 sps:$4 sm:$0xff]   ;;  %v3366_v52 = vld [vmem:[%s4135_s10 + $0x16c] ss:$16 sps:$4 sm:$0xff]  }
  0x9c   : > { %v4202_v53 = vld [vmem:[#allocation2] sm:$0xff]  ;;  %v3368_v54 = vld [vmem:[%s4135_s10 + $0x160] ss:$16 sps:$4 sm:$0xff]   ;;  %s2376_s29 = sshra.s32 %s2830_s28, 3  ;;  %vm1950_vm1 = vcmask 130048   ;;  %s547_s9 = sshra.s32 %s3971_s22, 1 }
  0x9d   : > { %v4198_v50 = vsub.s32 %v582_v44, %v4190_v43  ;;  %v3369_v56 = vld [vmem:[%s4135_s10 + $0x168] ss:$16 sps:$4 sm:$0xff]   ;;  %v3370_v57 = vld [vmem:[%s4135_s10 + $0x184] ss:$16 sps:$4 sm:$0xff]   ;;  %v3372_v58 = vld [vmem:[%s4135_s10 + $0x18c] ss:$16 sps:$4 sm:$0xff]  }
  0x9e   : > { %1963 = vmatpush1.bf16.msra.mxu0 %v3326_v19  ;;  %2168 = vmatpush1.bf16.msra.mxu1 %v3327_v20  ;;  %v3374_v60 = vld [vmem:[%s4135_s10 + $0x180] ss:$16 sps:$4 sm:$0xff]   ;;  %v3375_v62 = vld [vmem:[%s4135_s10 + $0x188] ss:$16 sps:$4 sm:$0xff]   ;;  %v3376_v63 = vld [vmem:[%s4135_s10 + $0x1a4] ss:$16 sps:$4 sm:$0xff]  }
  0x9f   : > { %1964 = vmatprep.subr.bf16.mxu0 %v3328_v21  ;;  %2169 = vmatprep.subr.bf16.mxu1 %v3330_v22  ;;  %v586_v55 = vrot.slane %v4202_v53, %v4198_v50  ;;  %v3378_v0 = vld [vmem:[%s4135_s10 + $0x1ac] ss:$16 sps:$4 sm:$0xff]   ;;  %v3380_v1 = vld [vmem:[%s4135_s10 + $0x1a0] ss:$16 sps:$4 sm:$0xff]   ;;  %v3381_v2 = vld [vmem:[%s4135_s10 + $0x1a8] ss:$16 sps:$4 sm:$0xff]  }
  0xa0   : > { %v3382_v3 = vld [vmem:[%s4135_s10 + $0x1c4] ss:$16 sps:$4 sm:$0xff]   ;;  %v3384_v4 = vld [vmem:[%s4135_s10 + $0x1cc] ss:$16 sps:$4 sm:$0xff]   ;;  %v3386_v5 = vld [vmem:[%s4135_s10 + $0x1c0] ss:$16 sps:$4 sm:$0xff]  }
  0xa1   : > { %v594_v59 = vcombine.high %v586_v55, %v586_v55  ;;  %v3387_v6 = vld [vmem:[%s4135_s10 + $0x1c8] ss:$16 sps:$4 sm:$0xff]   ;;  %v3388_v7 = vld [vmem:[%s4135_s10 + $0x1e4] ss:$16 sps:$4 sm:$0xff]   ;;  %v3390_v8 = vld [vmem:[%s4135_s10 + $0x1ec] ss:$16 sps:$4 sm:$0xff]   ;;  %v4229_v14 = vrot.slane %v586_v55, %v4198_v50 }
  0xa2   : > { %1965 = vmatpush1.bf16.msra.mxu0 %v3332_v23  ;;  %2170 = vmatpush1.bf16.msra.mxu1 %v3333_v24  ;;  %v3392_v9 = vld [vmem:[%s4135_s10 + $0x1e0] ss:$16 sps:$4 sm:$0xff]   ;;  %v3393_v10 = vld [vmem:[%s4135_s10 + $0x1e8] ss:$16 sps:$4 sm:$0xff]   ;;  %v3396_v11 = vld [vmem:[%s4135_s10 + $0x204] ss:$16 sps:$4 sm:$0xff]  }
  0xa3   : > { %1966 = vmatprep.subr.bf16.mxu0 %v3334_v25  ;;  %2171 = vmatprep.subr.bf16.mxu1 %v3336_v26  ;;  %v616_v61 = vrot.slane %v594_v59, %v4198_v50  ;;  %v3399_v12 = vld [vmem:[%s4135_s10 + $0x20c] ss:$16 sps:$4 sm:$0xff]   ;;  %v3394_v13 = vld [vmem:[%s4135_s10 + $0x200] ss:$16 sps:$4 sm:$0xff]   ;;  %v3397_v15 = vld [vmem:[%s4135_s10 + $0x208] ss:$16 sps:$4 sm:$0xff]  }
  0xa4   : > { %v3402_v16 = vld [vmem:[%s4135_s10 + $0x224] ss:$16 sps:$4 sm:$0xff]   ;;  %v3405_v17 = vld [vmem:[%s4135_s10 + $0x22c] ss:$16 sps:$4 sm:$0xff]   ;;  %v3400_v19 = vld [vmem:[%s4135_s10 + $0x220] ss:$16 sps:$4 sm:$0xff]  }
  0xa5   : > { %1986 = vmatprep.mubr.bf16.mxu0 %v616_v61  ;;  %2191 = vmatprep.mubr.bf16.mxu1 %v616_v61  ;;  %v626_v18 = vcombine.high %v616_v61, %v616_v61  ;;  %v3403_v20 = vld [vmem:[%s4135_s10 + $0x228] ss:$16 sps:$4 sm:$0xff]   ;;  %v3408_v21 = vld [vmem:[%s4135_s10 + $0x244] ss:$16 sps:$4 sm:$0xff]   ;;  %v3411_v22 = vld [vmem:[%s4135_s10 + $0x24c] ss:$16 sps:$4 sm:$0xff]  }
  0xa6   : > { %1967 = vmatpush1.bf16.msra.mxu0 %v3338_v27  ;;  %2172 = vmatpush1.bf16.msra.mxu1 %v3339_v28  ;;  %v3406_v23 = vld [vmem:[%s4135_s10 + $0x240] ss:$16 sps:$4 sm:$0xff]   ;;  %v3409_v24 = vld [vmem:[%s4135_s10 + $0x248] ss:$16 sps:$4 sm:$0xff]   ;;  %v3414_v25 = vld [vmem:[%s4135_s10 + $0x264] ss:$16 sps:$4 sm:$0xff]  }
  0xa7   : > { %1968 = vmatprep.subr.bf16.mxu0 %v3340_v29  ;;  %2173 = vmatprep.subr.bf16.mxu1 %v3342_v30  ;;  %v3417_v26 = vld [vmem:[%s4135_s10 + $0x26c] ss:$16 sps:$4 sm:$0xff]   ;;  %v3412_v27 = vld [vmem:[%s4135_s10 + $0x260] ss:$16 sps:$4 sm:$0xff]   ;;  %v3415_v28 = vld [vmem:[%s4135_s10 + $0x268] ss:$16 sps:$4 sm:$0xff]  }
  0xa8   : > { %v3420_v29 = vld [vmem:[%s4135_s10 + $0x284] ss:$16 sps:$4 sm:$0xff]   ;;  %v3423_v30 = vld [vmem:[%s4135_s10 + $0x28c] ss:$16 sps:$4 sm:$0xff]   ;;  %v3430_v39 = vld [vmem:[%s4135_s10 + $0x2c0] ss:$16 sps:$4 sm:$0xff]  }
  0xa9   : > { %v3432_v37 = vld [vmem:[%s4135_s10 + $0x2c4] ss:$16 sps:$4 sm:$0xff]   ;;  %v3435_v38 = vld [vmem:[%s4135_s10 + $0x2cc] ss:$16 sps:$4 sm:$0xff]   ;;  %v3436_v44 = vld [vmem:[%s4135_s10 + $0x2e0] ss:$16 sps:$4 sm:$0xff]  }
  0xaa   : > { %1969 = vmatpush1.bf16.msra.mxu0 %v3344_v31  ;;  %2174 = vmatpush1.bf16.msra.mxu1 %v3345_v32  ;;  %v3418_v31 = vld [vmem:[%s4135_s10 + $0x280] ss:$16 sps:$4 sm:$0xff]   ;;  %v3421_v32 = vld [vmem:[%s4135_s10 + $0x288] ss:$16 sps:$4 sm:$0xff]   ;;  %v3465_v61 = vld [vmem:[%s4135_s10 + $0x36c] ss:$16 sps:$4 sm:$0xff]  }
  0xab   : > { %1970 = vmatprep.subr.bf16.mxu0 %v3346_v33  ;;  %2175 = vmatprep.subr.bf16.mxu1 %v3348_v34  ;;  %v3426_v33 = vld [vmem:[%s4135_s10 + $0x2a4] ss:$16 sps:$4 sm:$0xff]   ;;  %v3429_v34 = vld [vmem:[%s4135_s10 + $0x2ac] ss:$16 sps:$4 sm:$0xff]   ;;  %v3451_v55 = vld [vmem:[%s4135_s10 + $0x328] ss:$16 sps:$4 sm:$0xff]  }
  0xac   : > { %v3457_v59 = vld [vmem:[%s4135_s10 + $0x348] ss:$16 sps:$4 sm:$0xff]   ;;  %s3096_s14 = sshll.u32 %s2376_s29, 2  ;;  %s3133_s6 = sshll.u32 %s547_s9, 3  ;;  %vm2722_vm6 = vcmask 58368  }
  0xad   : > { %s4360_s8 = scalar_lea.vmem %s4535_s3, %s3096_s14  ;;  %s553_s24 = sadd.s32 %s3133_s6, %s235_s13 }
  0xae   : > { %1971 = vmatpush1.bf16.msra.mxu0 %v3350_v35  ;;  %2176 = vmatpush1.bf16.msra.mxu1 %v3351_v36  ;;  %v3424_v35 = vld [vmem:[%s4135_s10 + $0x2a0] ss:$16 sps:$4 sm:$0xff]   ;;  %v3427_v36 = vld [vmem:[%s4135_s10 + $0x2a8] ss:$16 sps:$4 sm:$0xff]   ;;  %s554_s30 = scalar_lea.vmem [#allocation7], %s553_s24  ;;  %s3921_s25 = smov [#allocation10]  }
  0xaf   : > { %1972 = vmatprep.subr.bf16.mxu0 %v3352_v40  ;;  %2177 = vmatprep.subr.bf16.mxu1 %v3354_v41  ;;  %v3433_v40 = vld [vmem:[%s4135_s10 + $0x2c8] ss:$16 sps:$4 sm:$0xff]   ;;  %v3438_v41 = vld [vmem:[%s4135_s10 + $0x2e4] ss:$16 sps:$4 sm:$0xff]   ;;  %s2731_s27 = sshll.u32 %s3921_s25, 4  ;;  %p3256_p12 = scmp.eq.s32.totalorder %s3971_s22, 1  ;;  %s2732_s27 = int_to_ptr.vmem [resolvable:$true] %s2731_s27 }
  0xb0   : > { %s3835_s16 = scalar_lea.vmem %s2732_s27, 32  ;;  %p3842_p10 = scmp.lt.s32.totalorder %s2732_s27, %s2732_s27 }
  0xb1   : > { %p3836_p13 = scmp.ne.s32.totalorder %s2732_s27, %s3835_s16  ;;  %p3843_p1 = scmp.lt.s32.totalorder %s3835_s16, %s3835_s16 }
  0xb2   : > { %1973 = vmatpush1.bf16.msra.mxu0 %v3356_v42  ;;  %2178 = vmatpush1.bf16.msra.mxu1 %v3357_v45  ;;  %v3441_v42 = vld [vmem:[%s4135_s10 + $0x2ec] ss:$16 sps:$4 sm:$0xff]   ;;  %v3439_v45 = vld [vmem:[%s4135_s10 + $0x2e8] ss:$16 sps:$4 sm:$0xff]  }
  0xb3   : > { %1974 = vmatprep.subr.bf16.mxu0 %v3358_v46  ;;  %2179 = vmatprep.subr.bf16.mxu1 %v3360_v47  ;;  %v3444_v46 = vld [vmem:[%s4135_s10 + $0x304] ss:$16 sps:$4 sm:$0xff]   ;;  %v3447_v47 = vld [vmem:[%s4135_s10 + $0x30c] ss:$16 sps:$4 sm:$0xff]   ;;  %p3837_p5 = pnand %p3836_p13, %p3256_p12  ;;  %p3844_p8 = por %p3843_p1, %p3842_p10 }
  0xb5   : > { %p3838_p9 = pneg %p3837_p5 }
  0xb6   : > { %1975 = vmatpush1.bf16.msra.mxu0 %v3362_v48  ;;  %2180 = vmatpush1.bf16.msra.mxu1 %v3363_v49  ;;  %v3442_v48 = vld [vmem:[%s4135_s10 + $0x300] ss:$16 sps:$4 sm:$0xff]   ;;  %v3445_v49 = vld [vmem:[%s4135_s10 + $0x308] ss:$16 sps:$4 sm:$0xff]  }
  0xb7   : > { %1976 = vmatprep.subr.bf16.mxu0 %v3364_v51  ;;  %2181 = vmatprep.subr.bf16.mxu1 %v3366_v52  ;;  %v3450_v51 = vld [vmem:[%s4135_s10 + $0x324] ss:$16 sps:$4 sm:$0xff]   ;;  %v3453_v52 = vld [vmem:[%s4135_s10 + $0x32c] ss:$16 sps:$4 sm:$0xff]   ;;  %p3845_p0 = pnand %p3844_p8, %p3838_p9 }
  0xba   : > { %1977 = vmatpush1.bf16.msra.mxu0 %v3368_v54  ;;  %2182 = vmatpush1.bf16.msra.mxu1 %v3369_v56  ;;  %v3448_v54 = vld [vmem:[%s4135_s10 + $0x320] ss:$16 sps:$4 sm:$0xff]   ;;  %v3456_v56 = vld [vmem:[%s4135_s10 + $0x344] ss:$16 sps:$4 sm:$0xff]  }
  0xbb   : > { %1978 = vmatprep.subr.bf16.mxu0 %v3370_v57  ;;  %2183 = vmatprep.subr.bf16.mxu1 %v3372_v58  ;;  %v3459_v57 = vld [vmem:[%s4135_s10 + $0x34c] ss:$16 sps:$4 sm:$0xff]   ;;  %v3454_v58 = vld [vmem:[%s4135_s10 + $0x340] ss:$16 sps:$4 sm:$0xff]  }
  0xbe   : > { %1979 = vmatpush1.bf16.msra.mxu0 %v3374_v60  ;;  %2184 = vmatpush1.bf16.msra.mxu1 %v3375_v62  ;;  %v3462_v60 = vld [vmem:[%s4135_s10 + $0x364] ss:$16 sps:$4 sm:$0xff]   ;;  %v3460_v62 = vld [vmem:[%s4135_s10 + $0x360] ss:$16 sps:$4 sm:$0xff]  }
  0xbf   : > { %1980 = vmatprep.subr.bf16.mxu0 %v3376_v63  ;;  %2185 = vmatprep.subr.bf16.mxu1 %v3378_v0  ;;  %v3463_v63 = vld [vmem:[%s4135_s10 + $0x368] ss:$16 sps:$4 sm:$0xff]   ;;  %v3468_v0 = vld [vmem:[%s4135_s10 + $0x384] ss:$16 sps:$4 sm:$0xff]  }
  0xc2   : > { %1981 = vmatpush1.bf16.msra.mxu0 %v3380_v1  ;;  %2186 = vmatpush1.bf16.msra.mxu1 %v3381_v2  ;;  %v3471_v1 = vld [vmem:[%s4135_s10 + $0x38c] ss:$16 sps:$4 sm:$0xff]   ;;  %v3466_v2 = vld [vmem:[%s4135_s10 + $0x380] ss:$16 sps:$4 sm:$0xff]  }
  0xc3   : > { %1982 = vmatprep.subr.bf16.mxu0 %v3382_v3  ;;  %2187 = vmatprep.subr.bf16.mxu1 %v3384_v4  ;;  %v3469_v3 = vld [vmem:[%s4135_s10 + $0x388] ss:$16 sps:$4 sm:$0xff]   ;;  %v3474_v4 = vld [vmem:[%s4135_s10 + $0x3a4] ss:$16 sps:$4 sm:$0xff]  }
  0xc6   : > { %1983 = vmatpush1.bf16.msra.mxu0 %v3386_v5  ;;  %2188 = vmatpush1.bf16.msra.mxu1 %v3387_v6  ;;  %v3477_v5 = vld [vmem:[%s4135_s10 + $0x3ac] ss:$16 sps:$4 sm:$0xff]   ;;  %v3472_v6 = vld [vmem:[%s4135_s10 + $0x3a0] ss:$16 sps:$4 sm:$0xff]  }
  0xc7   : > { %1984 = vmatprep.subr.bf16.mxu0 %v3388_v7  ;;  %2189 = vmatprep.subr.bf16.mxu1 %v3390_v8  ;;  %v3475_v7 = vld [vmem:[%s4135_s10 + $0x3a8] ss:$16 sps:$4 sm:$0xff]   ;;  %v3480_v8 = vld [vmem:[%s4135_s10 + $0x3c4] ss:$16 sps:$4 sm:$0xff]  }
  0xca   : > { %1985 = vmatpush1.bf16.msra.mxu0 %v3392_v9  ;;  %2190 = vmatpush1.bf16.msra.mxu1 %v3393_v10  ;;  %v3483_v9 = vld [vmem:[%s4135_s10 + $0x3cc] ss:$16 sps:$4 sm:$0xff]   ;;  %v579_v10 = vcombine.high %v4202_v53, %v4202_v53  ;;  %v3487_v53 = vld [vmem:[%s4135_s10 + $0x3e8] ss:$16 sps:$4 sm:$0xff]  }
  0xcb   : > { %1995 = vmatprep.subr.bf16.mxu0 %v3396_v11  ;;  %2200 = vmatprep.subr.bf16.mxu1 %v3399_v12  ;;  %v3478_v11 = vld [vmem:[%s4135_s10 + $0x3c0] ss:$16 sps:$4 sm:$0xff]   ;;  %v3481_v12 = vld [vmem:[%s4135_s10 + $0x3c8] ss:$16 sps:$4 sm:$0xff]  }
  0xcd   : > { %1987 = vmatmul.mubr.bf16.vlgmr.msra.gmra.mrb[0].mxu0 %v4229_v14  ;;  %2192 = vmatmul.mubr.bf16.vlgmr.msra.gmra.mrb[0].mxu1 %v4229_v14 }
  0xce   : > { %1996 = vmatpush1.bf16.msra.mxu0 %v3394_v13  ;;  %2201 = vmatpush1.bf16.msra.mxu1 %v3397_v15  ;;  %v3486_v13 = vld [vmem:[%s4135_s10 + $0x3e4] ss:$16 sps:$4 sm:$0xff]   ;;  %v3489_v15 = vld [vmem:[%s4135_s10 + $0x3ec] ss:$16 sps:$4 sm:$0xff]  }
  0xcf   : > { %1997 = vmatprep.subr.bf16.mxu0 %v3402_v16  ;;  %2202 = vmatprep.subr.bf16.mxu1 %v3405_v17  ;;  %v4295_v16 = vrot.slane %v579_v10, %v4198_v50  ;;  %v3484_v17 = vld [vmem:[%s4135_s10 + $0x3e0] ss:$16 sps:$4 sm:$0xff]   ;;  %v3565_v10 = vld [vmem:[%s4135_s10 + $0x588] ss:$16 sps:$4 sm:$0xff]  }
  0xd0   : > { %2027 = vmatprep.mubr.bf16.mxu0 %v626_v18  ;;  %2232 = vmatprep.mubr.bf16.mxu1 %v626_v18  ;;  %v3492_v18 = vld [vmem:[%s4135_s10 + $0x404] ss:$16 sps:$4 sm:$0xff]  }
  0xd2   : > { %1998 = vmatpush1.bf16.msra.mxu0 %v3400_v19  ;;  %2203 = vmatpush1.bf16.msra.mxu1 %v3403_v20  ;;  %v3495_v19 = vld [vmem:[%s4135_s10 + $0x40c] ss:$16 sps:$4 sm:$0xff]   ;;  %v595_v20 = vcombine.high %v4295_v16, %v4295_v16 }
  0xd3   : > { %1999 = vmatprep.subr.bf16.mxu0 %v3408_v21  ;;  %2204 = vmatprep.subr.bf16.mxu1 %v3411_v22  ;;  %v3490_v21 = vld [vmem:[%s4135_s10 + $0x400] ss:$16 sps:$4 sm:$0xff]   ;;  %v624_v22 = vcombine.high %v4229_v14, %v4229_v14  ;;  %v3499_v14 = vld [vmem:[%s4135_s10 + $0x428] ss:$16 sps:$4 sm:$0xff]  }
  0xd6   : > { %2000 = vmatpush1.bf16.msra.mxu0 %v3406_v23  ;;  %2205 = vmatpush1.bf16.msra.mxu1 %v3409_v24  ;;  %v3493_v23 = vld [vmem:[%s4135_s10 + $0x408] ss:$16 sps:$4 sm:$0xff]   ;;  %v3498_v24 = vld [vmem:[%s4135_s10 + $0x424] ss:$16 sps:$4 sm:$0xff]  }
  0xd7   : > { %2001 = vmatprep.subr.bf16.mxu0 %v3414_v25  ;;  %2206 = vmatprep.subr.bf16.mxu1 %v3417_v26  ;;  %v3501_v25 = vld [vmem:[%s4135_s10 + $0x42c] ss:$16 sps:$4 sm:$0xff]   ;;  %v4310_v26 = vrot.slane %v595_v20, %v4198_v50  ;;  %v3582_v20 = vld [vmem:[%s4135_s10 + $0x5e4] ss:$16 sps:$4 sm:$0xff]  }
  0xda   : > { %2002 = vmatpush1.bf16.msra.mxu0 %v3412_v27  ;;  %2207 = vmatpush1.bf16.msra.mxu1 %v3415_v28  ;;  %v3496_v27 = vld [vmem:[%s4135_s10 + $0x420] ss:$16 sps:$4 sm:$0xff]   ;;  %v3504_v28 = vld [vmem:[%s4135_s10 + $0x444] ss:$16 sps:$4 sm:$0xff]  }
  0xdb   : > { %2003 = vmatprep.subr.bf16.mxu0 %v3420_v29  ;;  %2208 = vmatprep.subr.bf16.mxu1 %v3423_v30  ;;  %v3507_v29 = vld [vmem:[%s4135_s10 + $0x44c] ss:$16 sps:$4 sm:$0xff]   ;;  %v3502_v30 = vld [vmem:[%s4135_s10 + $0x440] ss:$16 sps:$4 sm:$0xff]  }
  0xde   : > { %2004 = vmatpush1.bf16.msra.mxu0 %v3418_v31  ;;  %2209 = vmatpush1.bf16.msra.mxu1 %v3421_v32  ;;  %v3505_v31 = vld [vmem:[%s4135_s10 + $0x448] ss:$16 sps:$4 sm:$0xff]   ;;  %v3510_v32 = vld [vmem:[%s4135_s10 + $0x464] ss:$16 sps:$4 sm:$0xff]  }
  0xdf   : > { %2005 = vmatprep.subr.bf16.mxu0 %v3426_v33  ;;  %2210 = vmatprep.subr.bf16.mxu1 %v3429_v34  ;;  %v3513_v33 = vld [vmem:[%s4135_s10 + $0x46c] ss:$16 sps:$4 sm:$0xff]   ;;  %v3508_v34 = vld [vmem:[%s4135_s10 + $0x460] ss:$16 sps:$4 sm:$0xff]  }
  0xe2   : > { %2006 = vmatpush1.bf16.msra.mxu0 %v3424_v35  ;;  %2211 = vmatpush1.bf16.msra.mxu1 %v3427_v36  ;;  %v3511_v35 = vld [vmem:[%s4135_s10 + $0x468] ss:$16 sps:$4 sm:$0xff]   ;;  %v3516_v36 = vld [vmem:[%s4135_s10 + $0x484] ss:$16 sps:$4 sm:$0xff]  }
  0xe3   : > { %2007 = vmatprep.subr.bf16.mxu0 %v3432_v37  ;;  %2212 = vmatprep.subr.bf16.mxu1 %v3435_v38  ;;  %v3519_v37 = vld [vmem:[%s4135_s10 + $0x48c] ss:$16 sps:$4 sm:$0xff]   ;;  %v3514_v38 = vld [vmem:[%s4135_s10 + $0x480] ss:$16 sps:$4 sm:$0xff]  }
  0xe6   : > { %2008 = vmatpush1.bf16.msra.mxu0 %v3430_v39  ;;  %2213 = vmatpush1.bf16.msra.mxu1 %v3433_v40  ;;  %v3517_v39 = vld [vmem:[%s4135_s10 + $0x488] ss:$16 sps:$4 sm:$0xff]   ;;  %v3522_v40 = vld [vmem:[%s4135_s10 + $0x4a4] ss:$16 sps:$4 sm:$0xff]  }
  0xe7   : > { %2009 = vmatprep.subr.bf16.mxu0 %v3438_v41  ;;  %2214 = vmatprep.subr.bf16.mxu1 %v3441_v42  ;;  %v3525_v41 = vld [vmem:[%s4135_s10 + $0x4ac] ss:$16 sps:$4 sm:$0xff]   ;;  %v3520_v42 = vld [vmem:[%s4135_s10 + $0x4a0] ss:$16 sps:$4 sm:$0xff]  }
  0xea   : > { %2010 = vmatpush1.bf16.msra.mxu0 %v3436_v44  ;;  %2215 = vmatpush1.bf16.msra.mxu1 %v3439_v45  ;;  %v3523_v44 = vld [vmem:[%s4135_s10 + $0x4a8] ss:$16 sps:$4 sm:$0xff]   ;;  %v3528_v45 = vld [vmem:[%s4135_s10 + $0x4c4] ss:$16 sps:$4 sm:$0xff]  }
  0xeb   : > { %2011 = vmatprep.subr.bf16.mxu0 %v3444_v46  ;;  %2216 = vmatprep.subr.bf16.mxu1 %v3447_v47  ;;  %v3531_v46 = vld [vmem:[%s4135_s10 + $0x4cc] ss:$16 sps:$4 sm:$0xff]   ;;  %v3526_v47 = vld [vmem:[%s4135_s10 + $0x4c0] ss:$16 sps:$4 sm:$0xff]  }
  0xee   : > { %2012 = vmatpush1.bf16.msra.mxu0 %v3442_v48  ;;  %2217 = vmatpush1.bf16.msra.mxu1 %v3445_v49  ;;  %v3529_v48 = vld [vmem:[%s4135_s10 + $0x4c8] ss:$16 sps:$4 sm:$0xff]   ;;  %v3534_v49 = vld [vmem:[%s4135_s10 + $0x4e4] ss:$16 sps:$4 sm:$0xff]  }
  0xef   : > { %2013 = vmatprep.subr.bf16.mxu0 %v3450_v51  ;;  %2218 = vmatprep.subr.bf16.mxu1 %v3453_v52  ;;  %v3537_v51 = vld [vmem:[%s4135_s10 + $0x4ec] ss:$16 sps:$4 sm:$0xff]   ;;  %v3532_v52 = vld [vmem:[%s4135_s10 + $0x4e0] ss:$16 sps:$4 sm:$0xff]  }
  0xf2   : > { %2014 = vmatpush1.bf16.msra.mxu0 %v3448_v54  ;;  %2219 = vmatpush1.bf16.msra.mxu1 %v3451_v55  ;;  %v3535_v54 = vld [vmem:[%s4135_s10 + $0x4e8] ss:$16 sps:$4 sm:$0xff]   ;;  %v3540_v55 = vld [vmem:[%s4135_s10 + $0x504] ss:$16 sps:$4 sm:$0xff]  }
  0xf3   : > { %2015 = vmatprep.subr.bf16.mxu0 %v3456_v56  ;;  %2220 = vmatprep.subr.bf16.mxu1 %v3459_v57  ;;  %v3543_v56 = vld [vmem:[%s4135_s10 + $0x50c] ss:$16 sps:$4 sm:$0xff]   ;;  %v3538_v57 = vld [vmem:[%s4135_s10 + $0x500] ss:$16 sps:$4 sm:$0xff]  }
  0xf6   : > { %2016 = vmatpush1.bf16.msra.mxu0 %v3454_v58  ;;  %2221 = vmatpush1.bf16.msra.mxu1 %v3457_v59  ;;  %v3541_v58 = vld [vmem:[%s4135_s10 + $0x508] ss:$16 sps:$4 sm:$0xff]   ;;  %v3546_v59 = vld [vmem:[%s4135_s10 + $0x524] ss:$16 sps:$4 sm:$0xff]  }
  0xf7   : > { %2017 = vmatprep.subr.bf16.mxu0 %v3462_v60  ;;  %2222 = vmatprep.subr.bf16.mxu1 %v3465_v61  ;;  %v3549_v60 = vld [vmem:[%s4135_s10 + $0x52c] ss:$16 sps:$4 sm:$0xff]   ;;  %v3544_v61 = vld [vmem:[%s4135_s10 + $0x520] ss:$16 sps:$4 sm:$0xff]  }
  0xfa   : > { %2018 = vmatpush1.bf16.msra.mxu0 %v3460_v62  ;;  %2223 = vmatpush1.bf16.msra.mxu1 %v3463_v63  ;;  %v3547_v62 = vld [vmem:[%s4135_s10 + $0x528] ss:$16 sps:$4 sm:$0xff]   ;;  %v3552_v63 = vld [vmem:[%s4135_s10 + $0x544] ss:$16 sps:$4 sm:$0xff]  }
  0xfb   : > { %2019 = vmatprep.subr.bf16.mxu0 %v3468_v0  ;;  %2224 = vmatprep.subr.bf16.mxu1 %v3471_v1  ;;  %v3555_v0 = vld [vmem:[%s4135_s10 + $0x54c] ss:$16 sps:$4 sm:$0xff]   ;;  %v3550_v1 = vld [vmem:[%s4135_s10 + $0x540] ss:$16 sps:$4 sm:$0xff]  }
  0xfe   : > { %2020 = vmatpush1.bf16.msra.mxu0 %v3466_v2  ;;  %2225 = vmatpush1.bf16.msra.mxu1 %v3469_v3  ;;  %v3553_v2 = vld [vmem:[%s4135_s10 + $0x548] ss:$16 sps:$4 sm:$0xff]   ;;  %v3558_v3 = vld [vmem:[%s4135_s10 + $0x564] ss:$16 sps:$4 sm:$0xff]  }
  0xff   : > { %2021 = vmatprep.subr.bf16.mxu0 %v3474_v4  ;;  %2226 = vmatprep.subr.bf16.mxu1 %v3477_v5  ;;  %v3561_v4 = vld [vmem:[%s4135_s10 + $0x56c] ss:$16 sps:$4 sm:$0xff]   ;;  %v3556_v5 = vld [vmem:[%s4135_s10 + $0x560] ss:$16 sps:$4 sm:$0xff]  }
 0x102   : > { %2022 = vmatpush1.bf16.msra.mxu0 %v3472_v6  ;;  %2227 = vmatpush1.bf16.msra.mxu1 %v3475_v7  ;;  %v3559_v6 = vld [vmem:[%s4135_s10 + $0x568] ss:$16 sps:$4 sm:$0xff]   ;;  %v3564_v7 = vld [vmem:[%s4135_s10 + $0x584] ss:$16 sps:$4 sm:$0xff]  }
 0x103   : > { %2023 = vmatprep.subr.bf16.mxu0 %v3480_v8  ;;  %2228 = vmatprep.subr.bf16.mxu1 %v3483_v9  ;;  %v3567_v8 = vld [vmem:[%s4135_s10 + $0x58c] ss:$16 sps:$4 sm:$0xff]   ;;  %v3562_v9 = vld [vmem:[%s4135_s10 + $0x580] ss:$16 sps:$4 sm:$0xff]  }
 0x106   : > { %2024 = vmatpush1.bf16.msra.mxu0 %v3478_v11  ;;  %2229 = vmatpush1.bf16.msra.mxu1 %v3481_v12  ;;  %v3570_v11 = vld [vmem:[%s4135_s10 + $0x5a4] ss:$16 sps:$4 sm:$0xff]   ;;  %v3573_v12 = vld [vmem:[%s4135_s10 + $0x5ac] ss:$16 sps:$4 sm:$0xff]  }
 0x107   : > { %2025 = vmatprep.subr.bf16.mxu0 %v3486_v13  ;;  %2230 = vmatprep.subr.bf16.mxu1 %v3489_v15  ;;  %v3568_v13 = vld [vmem:[%s4135_s10 + $0x5a0] ss:$16 sps:$4 sm:$0xff]   ;;  %v3571_v15 = vld [vmem:[%s4135_s10 + $0x5a8] ss:$16 sps:$4 sm:$0xff]  }
 0x10a   : > { %2026 = vmatpush1.bf16.msra.mxu0 %v3484_v17  ;;  %2231 = vmatpush1.bf16.msra.mxu1 %v3487_v53  ;;  %v3576_v17 = vld [vmem:[%s4135_s10 + $0x5c4] ss:$16 sps:$4 sm:$0xff]   ;;  %v3579_v53 = vld [vmem:[%s4135_s10 + $0x5cc] ss:$16 sps:$4 sm:$0xff]  }
 0x10b   : > { %2036 = vmatprep.subr.bf16.mxu0 %v3492_v18  ;;  %2241 = vmatprep.subr.bf16.mxu1 %v3495_v19  ;;  %v3574_v18 = vld [vmem:[%s4135_s10 + $0x5c0] ss:$16 sps:$4 sm:$0xff]   ;;  %v3577_v19 = vld [vmem:[%s4135_s10 + $0x5c8] ss:$16 sps:$4 sm:$0xff]  }
 0x10d   : > { %2028 = vmatmul.mubr.bf16.vlgmr.msra.gmra.mrb[0].mxu0 %v624_v22  ;;  %2233 = vmatmul.mubr.bf16.vlgmr.msra.gmra.mrb[0].mxu1 %v624_v22  ;;  %v3580_v22 = vld [vmem:[%s4135_s10 + $0x5e0] ss:$16 sps:$4 sm:$0xff]  }
 0x10e   : > { %2037 = vmatpush1.bf16.msra.mxu0 %v3490_v21  ;;  %2242 = vmatpush1.bf16.msra.mxu1 %v3493_v23  ;;  %v3585_v21 = vld [vmem:[%s4135_s10 + $0x5ec] ss:$16 sps:$4 sm:$0xff]   ;;  %v3583_v23 = vld [vmem:[%s4135_s10 + $0x5e8] ss:$16 sps:$4 sm:$0xff]  }
 0x10f   : > { %2038 = vmatprep.subr.bf16.mxu0 %v3498_v24  ;;  %2243 = vmatprep.subr.bf16.mxu1 %v3501_v25  ;;  %v3589_v24 = vld [vmem:[%s4135_s10 + $0x604] ss:$16 sps:$4 sm:$0xff]   ;;  %v3592_v25 = vld [vmem:[%s4135_s10 + $0x60c] ss:$16 sps:$4 sm:$0xff]  }
 0x110   : > { %2068 = vmatprep.mubr.bf16.mxu0 %v4310_v26  ;;  %2273 = vmatprep.mubr.bf16.mxu1 %v4310_v26 }
 0x112   : > { %2039 = vmatpush1.bf16.msra.mxu0 %v3496_v27  ;;  %2244 = vmatpush1.bf16.msra.mxu1 %v3499_v14  ;;  %v3587_v27 = vld [vmem:[%s4135_s10 + $0x600] ss:$16 sps:$4 sm:$0xff]   ;;  %v3590_v14 = vld [vmem:[%s4135_s10 + $0x608] ss:$16 sps:$4 sm:$0xff]  }
 0x113   : > { %2040 = vmatprep.subr.bf16.mxu0 %v3504_v28  ;;  %2245 = vmatprep.subr.bf16.mxu1 %v3507_v29  ;;  %v4384_v28 = vrot.slane %v4295_v16, %v4198_v50  ;;  %v3595_v29 = vld [vmem:[%s4135_s10 + $0x624] ss:$16 sps:$4 sm:$0xff]   ;;  %v3596_v16 = vld [vmem:[%s4135_s10 + $0x628] ss:$16 sps:$4 sm:$0xff]  }
 0x116   : > { %2041 = vmatpush1.bf16.msra.mxu0 %v3502_v30  ;;  %2246 = vmatpush1.bf16.msra.mxu1 %v3505_v31  ;;  %v3598_v30 = vld [vmem:[%s4135_s10 + $0x62c] ss:$16 sps:$4 sm:$0xff]   ;;  %v3593_v31 = vld [vmem:[%s4135_s10 + $0x620] ss:$16 sps:$4 sm:$0xff]  }
 0x117   : > { %2042 = vmatprep.subr.bf16.mxu0 %v3510_v32  ;;  %2247 = vmatprep.subr.bf16.mxu1 %v3513_v33  ;;  %v627_v32 = vcombine.high %v4310_v26, %v4310_v26  ;;  %v3601_v33 = vld [vmem:[%s4135_s10 + $0x644] ss:$16 sps:$4 sm:$0xff]  }
 0x118   : > { %v3607_v26 = vld [vmem:[%s4135_s10 + $0x664] ss:$16 sps:$4 sm:$0xff]  }
 0x11a   : > { %2043 = vmatpush1.bf16.msra.mxu0 %v3508_v34  ;;  %2248 = vmatpush1.bf16.msra.mxu1 %v3511_v35  ;;  %v3604_v34 = vld [vmem:[%s4135_s10 + $0x64c] ss:$16 sps:$4 sm:$0xff]   ;;  %v3599_v35 = vld [vmem:[%s4135_s10 + $0x640] ss:$16 sps:$4 sm:$0xff]  }
 0x11b   : > { %2044 = vmatprep.subr.bf16.mxu0 %v3516_v36  ;;  %2249 = vmatprep.subr.bf16.mxu1 %v3519_v37  ;;  %v3602_v36 = vld [vmem:[%s4135_s10 + $0x648] ss:$16 sps:$4 sm:$0xff]   ;;  %v3610_v37 = vld [vmem:[%s4135_s10 + $0x66c] ss:$16 sps:$4 sm:$0xff]  }
 0x11e   : > { %2045 = vmatpush1.bf16.msra.mxu0 %v3514_v38  ;;  %2250 = vmatpush1.bf16.msra.mxu1 %v3517_v39  ;;  %v3605_v38 = vld [vmem:[%s4135_s10 + $0x660] ss:$16 sps:$4 sm:$0xff]   ;;  %v3608_v39 = vld [vmem:[%s4135_s10 + $0x668] ss:$16 sps:$4 sm:$0xff]  }
 0x11f   : > { %2046 = vmatprep.subr.bf16.mxu0 %v3522_v40  ;;  %2251 = vmatprep.subr.bf16.mxu1 %v3525_v41  ;;  %v3613_v40 = vld [vmem:[%s4135_s10 + $0x684] ss:$16 sps:$4 sm:$0xff]   ;;  %v3616_v41 = vld [vmem:[%s4135_s10 + $0x68c] ss:$16 sps:$4 sm:$0xff]  }
 0x122   : > { %2047 = vmatpush1.bf16.msra.mxu0 %v3520_v42  ;;  %2252 = vmatpush1.bf16.msra.mxu1 %v3523_v44  ;;  %v3611_v42 = vld [vmem:[%s4135_s10 + $0x680] ss:$16 sps:$4 sm:$0xff]   ;;  %v3614_v44 = vld [vmem:[%s4135_s10 + $0x688] ss:$16 sps:$4 sm:$0xff]  }
 0x123   : > { %2048 = vmatprep.subr.bf16.mxu0 %v3528_v45  ;;  %2253 = vmatprep.subr.bf16.mxu1 %v3531_v46  ;;  %v3619_v45 = vld [vmem:[%s4135_s10 + $0x6a4] ss:$16 sps:$4 sm:$0xff]   ;;  %v3622_v46 = vld [vmem:[%s4135_s10 + $0x6ac] ss:$16 sps:$4 sm:$0xff]  }
 0x126   : > { %2049 = vmatpush1.bf16.msra.mxu0 %v3526_v47  ;;  %2254 = vmatpush1.bf16.msra.mxu1 %v3529_v48  ;;  %v3617_v47 = vld [vmem:[%s4135_s10 + $0x6a0] ss:$16 sps:$4 sm:$0xff]   ;;  %v3620_v48 = vld [vmem:[%s4135_s10 + $0x6a8] ss:$16 sps:$4 sm:$0xff]  }
 0x127   : > { %2050 = vmatprep.subr.bf16.mxu0 %v3534_v49  ;;  %2255 = vmatprep.subr.bf16.mxu1 %v3537_v51  ;;  %v3625_v49 = vld [vmem:[%s4135_s10 + $0x6c4] ss:$16 sps:$4 sm:$0xff]   ;;  %v3628_v51 = vld [vmem:[%s4135_s10 + $0x6cc] ss:$16 sps:$4 sm:$0xff]  }
 0x12a   : > { %2051 = vmatpush1.bf16.msra.mxu0 %v3532_v52  ;;  %2256 = vmatpush1.bf16.msra.mxu1 %v3535_v54  ;;  %v3623_v52 = vld [vmem:[%s4135_s10 + $0x6c0] ss:$16 sps:$4 sm:$0xff]   ;;  %v3626_v54 = vld [vmem:[%s4135_s10 + $0x6c8] ss:$16 sps:$4 sm:$0xff]  }
 0x12b   : > { %2052 = vmatprep.subr.bf16.mxu0 %v3540_v55  ;;  %2257 = vmatprep.subr.bf16.mxu1 %v3543_v56  ;;  %v3631_v55 = vld [vmem:[%s4135_s10 + $0x6e4] ss:$16 sps:$4 sm:$0xff]   ;;  %v3634_v56 = vld [vmem:[%s4135_s10 + $0x6ec] ss:$16 sps:$4 sm:$0xff]  }
 0x12e   : > { %2053 = vmatpush1.bf16.msra.mxu0 %v3538_v57  ;;  %2258 = vmatpush1.bf16.msra.mxu1 %v3541_v58  ;;  %v3629_v57 = vld [vmem:[%s4135_s10 + $0x6e0] ss:$16 sps:$4 sm:$0xff]   ;;  %v3632_v58 = vld [vmem:[%s4135_s10 + $0x6e8] ss:$16 sps:$4 sm:$0xff]  }
 0x12f   : > { %2054 = vmatprep.subr.bf16.mxu0 %v3546_v59  ;;  %2259 = vmatprep.subr.bf16.mxu1 %v3549_v60  ;;  %v3637_v59 = vld [vmem:[%s4135_s10 + $0x704] ss:$16 sps:$4 sm:$0xff]   ;;  %v3640_v60 = vld [vmem:[%s4135_s10 + $0x70c] ss:$16 sps:$4 sm:$0xff]  }
 0x132   : > { %2055 = vmatpush1.bf16.msra.mxu0 %v3544_v61  ;;  %2260 = vmatpush1.bf16.msra.mxu1 %v3547_v62  ;;  %v3635_v61 = vld [vmem:[%s4135_s10 + $0x700] ss:$16 sps:$4 sm:$0xff]   ;;  %v3638_v62 = vld [vmem:[%s4135_s10 + $0x708] ss:$16 sps:$4 sm:$0xff]  }
 0x133   : > { %2056 = vmatprep.subr.bf16.mxu0 %v3552_v63  ;;  %2261 = vmatprep.subr.bf16.mxu1 %v3555_v0  ;;  %v3643_v63 = vld [vmem:[%s4135_s10 + $0x724] ss:$16 sps:$4 sm:$0xff]   ;;  %v3646_v0 = vld [vmem:[%s4135_s10 + $0x72c] ss:$16 sps:$4 sm:$0xff]  }
 0x136   : > { %2057 = vmatpush1.bf16.msra.mxu0 %v3550_v1  ;;  %2262 = vmatpush1.bf16.msra.mxu1 %v3553_v2  ;;  %v3641_v1 = vld [vmem:[%s4135_s10 + $0x720] ss:$16 sps:$4 sm:$0xff]   ;;  %v3644_v2 = vld [vmem:[%s4135_s10 + $0x728] ss:$16 sps:$4 sm:$0xff]  }
 0x137   : > { %2058 = vmatprep.subr.bf16.mxu0 %v3558_v3  ;;  %2263 = vmatprep.subr.bf16.mxu1 %v3561_v4  ;;  %v3649_v3 = vld [vmem:[%s4135_s10 + $0x744] ss:$16 sps:$4 sm:$0xff]   ;;  %v3652_v4 = vld [vmem:[%s4135_s10 + $0x74c] ss:$16 sps:$4 sm:$0xff]  }
 0x13a   : > { %2059 = vmatpush1.bf16.msra.mxu0 %v3556_v5  ;;  %2264 = vmatpush1.bf16.msra.mxu1 %v3559_v6  ;;  %v3647_v5 = vld [vmem:[%s4135_s10 + $0x740] ss:$16 sps:$4 sm:$0xff]   ;;  %v3650_v6 = vld [vmem:[%s4135_s10 + $0x748] ss:$16 sps:$4 sm:$0xff]  }
 0x13b   : > { %2060 = vmatprep.subr.bf16.mxu0 %v3564_v7  ;;  %2265 = vmatprep.subr.bf16.mxu1 %v3567_v8  ;;  %v3655_v7 = vld [vmem:[%s4135_s10 + $0x764] ss:$16 sps:$4 sm:$0xff]   ;;  %v3658_v8 = vld [vmem:[%s4135_s10 + $0x76c] ss:$16 sps:$4 sm:$0xff]  }
 0x13e   : > { %2061 = vmatpush1.bf16.msra.mxu0 %v3562_v9  ;;  %2266 = vmatpush1.bf16.msra.mxu1 %v3565_v10  ;;  %v3653_v9 = vld [vmem:[%s4135_s10 + $0x760] ss:$16 sps:$4 sm:$0xff]   ;;  %v3656_v10 = vld [vmem:[%s4135_s10 + $0x768] ss:$16 sps:$4 sm:$0xff]  }
 0x13f   : > { %2062 = vmatprep.subr.bf16.mxu0 %v3570_v11  ;;  %2267 = vmatprep.subr.bf16.mxu1 %v3573_v12  ;;  %v3661_v11 = vld [vmem:[%s4135_s10 + $0x784] ss:$16 sps:$4 sm:$0xff]   ;;  %v3664_v12 = vld [vmem:[%s4135_s10 + $0x78c] ss:$16 sps:$4 sm:$0xff]  }
 0x142   : > { %2063 = vmatpush1.bf16.msra.mxu0 %v3568_v13  ;;  %2268 = vmatpush1.bf16.msra.mxu1 %v3571_v15  ;;  %v3659_v13 = vld [vmem:[%s4135_s10 + $0x780] ss:$16 sps:$4 sm:$0xff]   ;;  %v3662_v15 = vld [vmem:[%s4135_s10 + $0x788] ss:$16 sps:$4 sm:$0xff]  }
 0x143   : > { %2064 = vmatprep.subr.bf16.mxu0 %v3576_v17  ;;  %2269 = vmatprep.subr.bf16.mxu1 %v3579_v53  ;;  %v3667_v17 = vld [vmem:[%s4135_s10 + $0x7a4] ss:$16 sps:$4 sm:$0xff]   ;;  %v3670_v53 = vld [vmem:[%s4135_s10 + $0x7ac] ss:$16 sps:$4 sm:$0xff]  }
 0x146   : > { %2065 = vmatpush1.bf16.msra.mxu0 %v3574_v18  ;;  %2270 = vmatpush1.bf16.msra.mxu1 %v3577_v19  ;;  %v3665_v18 = vld [vmem:[%s4135_s10 + $0x7a0] ss:$16 sps:$4 sm:$0xff]   ;;  %v3668_v19 = vld [vmem:[%s4135_s10 + $0x7a8] ss:$16 sps:$4 sm:$0xff]  }
 0x147   : > { %2066 = vmatprep.subr.bf16.mxu0 %v3582_v20  ;;  %2271 = vmatprep.subr.bf16.mxu1 %v3585_v21  ;;  %v3673_v20 = vld [vmem:[%s4135_s10 + $0x7c4] ss:$16 sps:$4 sm:$0xff]   ;;  %v3676_v21 = vld [vmem:[%s4135_s10 + $0x7cc] ss:$16 sps:$4 sm:$0xff]  }
 0x14a   : > { %2067 = vmatpush1.bf16.msra.mxu0 %v3580_v22  ;;  %2272 = vmatpush1.bf16.msra.mxu1 %v3583_v23  ;;  %v3671_v22 = vld [vmem:[%s4135_s10 + $0x7c0] ss:$16 sps:$4 sm:$0xff]   ;;  %v3674_v23 = vld [vmem:[%s4135_s10 + $0x7c8] ss:$16 sps:$4 sm:$0xff]  }
 0x14b   : > { %2077 = vmatprep.subr.bf16.mxu0 %v3589_v24  ;;  %2282 = vmatprep.subr.bf16.mxu1 %v3592_v25  ;;  %v3679_v24 = vld [vmem:[%s4135_s10 + $0x7e4] ss:$16 sps:$4 sm:$0xff]   ;;  %v3682_v25 = vld [vmem:[%s4135_s10 + $0x7ec] ss:$16 sps:$4 sm:$0xff]  }
 0x14d   : > { %2069 = vmatmul.mubr.bf16.vlgmr.msra.gmra.mrb[0].mxu0 %v4384_v28  ;;  %2274 = vmatmul.mubr.bf16.vlgmr.msra.gmra.mrb[0].mxu1 %v4384_v28 }
 0x14e   : > { %2078 = vmatpush1.bf16.msra.mxu0 %v3587_v27  ;;  %2283 = vmatpush1.bf16.msra.mxu1 %v3590_v14  ;;  %v3677_v27 = vld [vmem:[%s4135_s10 + $0x7e0] ss:$16 sps:$4 sm:$0xff]   ;;  %v3680_v14 = vld [vmem:[%s4135_s10 + $0x7e8] ss:$16 sps:$4 sm:$0xff]  }
 0x14f   : > { %2079 = vmatprep.subr.bf16.mxu0 %v3595_v29  ;;  %2284 = vmatprep.subr.bf16.mxu1 %v3598_v30  ;;  %v3685_v29 = vld [vmem:[%s4135_s10 + $0x804] ss:$16 sps:$4 sm:$0xff]   ;;  %v3688_v30 = vld [vmem:[%s4135_s10 + $0x80c] ss:$16 sps:$4 sm:$0xff]  }
 0x150   : > { %2109 = vmatprep.mubr.bf16.mxu0 %v627_v32  ;;  %2314 = vmatprep.mubr.bf16.mxu1 %v627_v32  ;;  %v3683_v32 = vld [vmem:[%s4135_s10 + $0x800] ss:$16 sps:$4 sm:$0xff]  }
 0x152   : > { %2080 = vmatpush1.bf16.msra.mxu0 %v3593_v31  ;;  %2285 = vmatpush1.bf16.msra.mxu1 %v3596_v16  ;;  %v625_v31 = vcombine.high %v4384_v28, %v4384_v28  ;;  %v3686_v16 = vld [vmem:[%s4135_s10 + $0x808] ss:$16 sps:$4 sm:$0xff]   ;;  %v2833_v28 = vld.sshfl [vmem:[#allocation2 + $0x8] sm:$0x1 pattern:$0x75316420] }
 0x153   : > { %2081 = vmatprep.subr.bf16.mxu0 %v3601_v33  ;;  %2286 = vmatprep.subr.bf16.mxu1 %v3604_v34  ;;  %v3689_v33 = vld [vmem:[%s4360_s8 + $0x40] sm:$0xff]  }
 0x154   : > { %v3690_v34 = vld [vmem:[%s4360_s8 + $0xc0] sm:$0xff]  }
 0x156   : > { %2082 = vmatpush1.bf16.msra.mxu0 %v3599_v35  ;;  %2287 = vmatpush1.bf16.msra.mxu1 %v3602_v36  ;;  %v3920_v35 = vmov 0   ;;  %v641_v36 = vrot.slane %v2833_v28, %v4198_v50  ;;  %v3697_v50 = vld [vmem:[%s4360_s8 + $0x50] sm:$0xff]  }
 0x157   : > { %2083 = vmatprep.subr.bf16.mxu0 %v3607_v26  ;;  %2288 = vmatprep.subr.bf16.mxu1 %v3610_v37  ;;  %v3691_v26 = vld [vmem:[%s4360_s8] sm:$0xff]  }
 0x158   : > { %v3692_v37 = vld [vmem:[%s4360_s8 + $0x80] sm:$0xff]  }
 0x15a   : > { %2084 = vmatpush1.bf16.msra.mxu0 %v3605_v38  ;;  %2289 = vmatpush1.bf16.msra.mxu1 %v3608_v39  ;;  %v3693_v38 = vld [vmem:[%s4360_s8 + $0x48] sm:$0xff]  }
 0x15b   : > { %2085 = vmatprep.subr.bf16.mxu0 %v3613_v40  ;;  %2290 = vmatprep.subr.bf16.mxu1 %v3616_v41  ;;  %v3694_v39 = vld [vmem:[%s4360_s8 + $0xc8] sm:$0xff]  }
 0x15c   : > { %v3695_v40 = vld [vmem:[%s4360_s8 + $0x8] sm:$0xff]  }
 0x15d   : > { %v3696_v41 = vld [vmem:[%s4360_s8 + $0x88] sm:$0xff]  }
 0x15e   : > { %2086 = vmatpush1.bf16.msra.mxu0 %v3611_v42  ;;  %2291 = vmatpush1.bf16.msra.mxu1 %v3614_v44  ;;  %v3698_v42 = vld [vmem:[%s4360_s8 + $0xd0] sm:$0xff]  }
 0x15f   : > { %2087 = vmatprep.subr.bf16.mxu0 %v3619_v45  ;;  %2292 = vmatprep.subr.bf16.mxu1 %v3622_v46  ;;  %v3699_v44 = vld [vmem:[%s4360_s8 + $0x10] sm:$0xff]   ;;  %v3701_v46 = vld [vmem:[%s4360_s8 + $0x58] sm:$0xff]  }
 0x160   : > { %v3700_v45 = vld [vmem:[%s4360_s8 + $0x90] sm:$0xff]  }
 0x162   : > { %2088 = vmatpush1.bf16.msra.mxu0 %v3617_v47  ;;  %2293 = vmatpush1.bf16.msra.mxu1 %v3620_v48  ;;  %v3702_v47 = vld [vmem:[%s4360_s8 + $0xd8] sm:$0xff]  }
 0x163   : > { %2089 = vmatprep.subr.bf16.mxu0 %v3625_v49  ;;  %2294 = vmatprep.subr.bf16.mxu1 %v3628_v51  ;;  %v3703_v48 = vld [vmem:[%s4360_s8 + $0x18] sm:$0xff]   ;;  %v3705_v51 = vld [vmem:[%s4360_s8 + $0x60] sm:$0xff]  }
 0x164   : > { %v3704_v49 = vld [vmem:[%s4360_s8 + $0x98] sm:$0xff]  }
 0x166   : > { %2090 = vmatpush1.bf16.msra.mxu0 %v3623_v52  ;;  %2295 = vmatpush1.bf16.msra.mxu1 %v3626_v54  ;;  %v3706_v52 = vld [vmem:[%s4360_s8 + $0xe0] sm:$0xff]  }
 0x167   : > { %2091 = vmatprep.subr.bf16.mxu0 %v3631_v55  ;;  %2296 = vmatprep.subr.bf16.mxu1 %v3634_v56  ;;  %v3707_v54 = vld [vmem:[%s4360_s8 + $0x20] sm:$0xff]   ;;  %v3709_v56 = vld [vmem:[%s4360_s8 + $0x68] sm:$0xff]  }
 0x168   : > { %v3708_v55 = vld [vmem:[%s4360_s8 + $0xa0] sm:$0xff]  }
 0x16a   : > { %2092 = vmatpush1.bf16.msra.mxu0 %v3629_v57  ;;  %2297 = vmatpush1.bf16.msra.mxu1 %v3632_v58  ;;  %v3710_v57 = vld [vmem:[%s4360_s8 + $0xe8] sm:$0xff]  }
 0x16b   : > { %2093 = vmatprep.subr.bf16.mxu0 %v3637_v59  ;;  %2298 = vmatprep.subr.bf16.mxu1 %v3640_v60  ;;  %v3711_v58 = vld [vmem:[%s4360_s8 + $0x28] sm:$0xff]   ;;  %v3713_v60 = vld [vmem:[%s4360_s8 + $0x70] sm:$0xff]  }
 0x16c   : > { %v3712_v59 = vld [vmem:[%s4360_s8 + $0xa8] sm:$0xff]  }
 0x16e   : > { %2094 = vmatpush1.bf16.msra.mxu0 %v3635_v61  ;;  %2299 = vmatpush1.bf16.msra.mxu1 %v3638_v62  ;;  %v3714_v61 = vld [vmem:[%s4360_s8 + $0xf0] sm:$0xff]  }
 0x16f   : > { %2095 = vmatprep.subr.bf16.mxu0 %v3643_v63  ;;  %2300 = vmatprep.subr.bf16.mxu1 %v3646_v0  ;;  %v3715_v62 = vld [vmem:[%s4360_s8 + $0x30] sm:$0xff]   ;;  %v3717_v0 = vld [vmem:[%s4360_s8 + $0x78] sm:$0xff]  }
 0x170   : > { %v3716_v63 = vld [vmem:[%s4360_s8 + $0xb0] sm:$0xff]  }
 0x172   : > { %2096 = vmatpush1.bf16.msra.mxu0 %v3641_v1  ;;  %2301 = vmatpush1.bf16.msra.mxu1 %v3644_v2  ;;  %v3718_v1 = vld [vmem:[%s4360_s8 + $0xf8] sm:$0xff]  }
 0x173   : > { %2097 = vmatprep.subr.bf16.mxu0 %v3649_v3  ;;  %2302 = vmatprep.subr.bf16.mxu1 %v3652_v4  ;;  %v3719_v2 = vld [vmem:[%s4360_s8 + $0x38] sm:$0xff]   ;;  %v559_v4 = vsub.s32 0, %v4190_v43 }
 0x174   : > { %v3720_v3 = vld [vmem:[%s4360_s8 + $0xb8] sm:$0xff]  }
 0x176   : > { %2098 = vmatpush1.bf16.msra.mxu0 %v3647_v5  ;;  %2303 = vmatpush1.bf16.msra.mxu1 %v3650_v6  ;;  %v567_v5 = vsub.s32 2, %v4190_v43  ;;  %v555_v6 = vld [vmem:[%s554_s30] ss:$2 sm:$0xf] }
 0x177   : > { %2099 = vmatprep.subr.bf16.mxu0 %v3655_v7  ;;  %2304 = vmatprep.subr.bf16.mxu1 %v3658_v8  ;;  %v563_v7 = vsub.s32 1, %v4190_v43  ;;  %v571_v8 = vsub.s32 3, %v4190_v43 }
 0x17a   : > { %2100 = vmatpush1.bf16.msra.mxu0 %v3653_v9  ;;  %2305 = vmatpush1.bf16.msra.mxu1 %v3656_v10  ;;  %v560_v9 = vrot.slane %v555_v6, %v559_v4  ;;  %v568_v10 = vrot.slane %v555_v6, %v567_v5 }
 0x17b   : > { %2101 = vmatprep.subr.bf16.mxu0 %v3661_v11  ;;  %2306 = vmatprep.subr.bf16.mxu1 %v3664_v12  ;;  %v564_v11 = vrot.slane %v555_v6, %v563_v7  ;;  %v572_v12 = vrot.slane %v555_v6, %v571_v8 }
 0x17e   : > { %2102 = vmatpush1.bf16.msra.mxu0 %v3659_v13  ;;  %2307 = vmatpush1.bf16.msra.mxu1 %v3662_v15 }
 0x17f   : > { %2103 = vmatprep.subr.bf16.mxu0 %v3667_v17  ;;  %2308 = vmatprep.subr.bf16.mxu1 %v3670_v53 }
 0x182   : > { %2104 = vmatpush1.bf16.msra.mxu0 %v3665_v18  ;;  %2309 = vmatpush1.bf16.msra.mxu1 %v3668_v19 }
 0x183   : > { %2105 = vmatprep.subr.bf16.mxu0 %v3673_v20  ;;  %2310 = vmatprep.subr.bf16.mxu1 %v3676_v21 }
 0x186   : > { %2106 = vmatpush1.bf16.msra.mxu0 %v3671_v22  ;;  %2311 = vmatpush1.bf16.msra.mxu1 %v3674_v23 }
 0x187   : > { %2107 = vmatprep.subr.bf16.mxu0 %v3679_v24  ;;  %2312 = vmatprep.subr.bf16.mxu1 %v3682_v25 }
 0x18a   : > { %2108 = vmatpush1.bf16.msra.mxu0 %v3677_v27  ;;  %2313 = vmatpush1.bf16.msra.mxu1 %v3680_v14 }
 0x18b   : > { %2118 = vmatprep.subr.bf16.mxu0 %v3685_v29  ;;  %2323 = vmatprep.subr.bf16.mxu1 %v3688_v30 }
 0x18d   : > { %2110 = vmatmul.mubr.bf16.vlgmr.msra.gmra.mrb[0].mxu0 %v625_v31  ;;  %2315 = vmatmul.mubr.bf16.vlgmr.msra.gmra.mrb[0].mxu1 %v625_v31 }
 0x18e   : > { %2119 = vmatpush1.bf16.msra.mxu0 %v3683_v32  ;;  %2324 = vmatpush1.bf16.msra.mxu1 %v3686_v16 }
 0x18f   : > { %2150 = vmatprep.mubr.bf16.mxu0 %v3920_v35  ;;  %2355 = vmatprep.mubr.bf16.mxu1 %v3920_v35 }
 0x190   : > { %3134 = vmatprep.subr.bf16.mxu0 %v3689_v33  ;;  %3156 = vmatprep.subr.bf16.mxu1 %v3690_v34 }
 0x199   : > { %3094 = vmatmul.mubr.msk.bf16.vlgmr.msra.gmra.mrb[0].mxu0 %vm1950_vm1, %v641_v36  ;;  %3095 = vmatmul.mubr.msk.bf16.vlgmr.msra.gmra.mrb[0].mxu1 %vm1950_vm1, %v641_v36 }
 0x19a   : > { %3135 = vmatpush3.bf16.msra.mxu0 %v3691_v26  ;;  %3157 = vmatpush3.bf16.msra.mxu1 %v3692_v37 }
 0x19b   : > { %3136 = vmatprep.subr.bf16.mxu0 %v3693_v38  ;;  %3158 = vmatprep.subr.bf16.mxu1 %v3694_v39 }
 0x19e   : > { %3137 = vmatpush3.bf16.msra.mxu0 %v3695_v40  ;;  %3159 = vmatpush3.bf16.msra.mxu1 %v3696_v41 }
 0x19f   : > { %3138 = vmatprep.subr.bf16.mxu0 %v3697_v50  ;;  %3160 = vmatprep.subr.bf16.mxu1 %v3698_v42 }
 0x1a2   : > { %3139 = vmatpush3.bf16.msra.mxu0 %v3699_v44  ;;  %3161 = vmatpush3.bf16.msra.mxu1 %v3700_v45  ;;  %v2444_v45 = vld [vmem:[#allocation10] sm:$0x3] }
 0x1a3   : > { %3140 = vmatprep.subr.bf16.mxu0 %v3701_v46  ;;  %3162 = vmatprep.subr.bf16.mxu1 %v3702_v47 }
 0x1a6   : > { %3141 = vmatpush3.bf16.msra.mxu0 %v3703_v48  ;;  %3163 = vmatpush3.bf16.msra.mxu1 %v3704_v49 }
 0x1a7   : > { %3142 = vmatprep.subr.bf16.mxu0 %v3705_v51  ;;  %3164 = vmatprep.subr.bf16.mxu1 %v3706_v52 }
 0x1aa   : > { %3143 = vmatpush3.bf16.msra.mxu0 %v3707_v54  ;;  %3165 = vmatpush3.bf16.msra.mxu1 %v3708_v55 }
 0x1ab   : > { %3144 = vmatprep.subr.bf16.mxu0 %v3709_v56  ;;  %3166 = vmatprep.subr.bf16.mxu1 %v3710_v57 }
 0x1ae   : > { %3145 = vmatpush3.bf16.msra.mxu0 %v3711_v58  ;;  %3167 = vmatpush3.bf16.msra.mxu1 %v3712_v59 }
 0x1af   : > { %3146 = vmatprep.subr.bf16.mxu0 %v3713_v60  ;;  %3168 = vmatprep.subr.bf16.mxu1 %v3714_v61 }
 0x1b2   : > { %3147 = vmatpush3.bf16.msra.mxu0 %v3715_v62  ;;  %3169 = vmatpush3.bf16.msra.mxu1 %v3716_v63 }
 0x1b3   : > { %3148 = vmatprep.subr.bf16.mxu0 %v3717_v0  ;;  %3170 = vmatprep.subr.bf16.mxu1 %v3718_v1 }
 0x1b6   : > { %3149 = vmatpush3.bf16.msra.mxu0 %v3719_v2  ;;  %3171 = vmatpush3.bf16.msra.mxu1 %v3720_v3 }
 0x26c   : > { %v2152_v13 = vpop.f32.mrb[0].mxu0  ;;  %v2357_v15 = vpop.f32.mrb[0].mxu1 }
 0x26d   : > { %v3178_v17 = vadd.f32 %v2152_v13, %v560_v9  ;;  %v3180_v53 = vadd.f32 %v2357_v15, %v568_v10  ;;  %v2154_v18 = vpop.f32.mrb[1].mxu0  ;;  %v2359_v19 = vpop.f32.mrb[1].mxu1 }
 0x26e   : > { %v3179_v20 = vadd.f32 %v2154_v18, %v564_v11  ;;  %v3181_v21 = vadd.f32 %v2359_v19, %v572_v12  ;;  %v2156_v22 = vpop.f32.mrb[2].mxu0  ;;  %v2361_v23 = vpop.f32.mrb[2].mxu1 }
 0x26f   : > { %vm2364_vm2 = vcmp.gt.f32.partialorder %v3178_v17, 0.0  ;;  %v2368_v24 = vmul.f32 0.01, %v3178_v17  ;;  %vm2366_vm3 = vcmp.gt.f32.partialorder %v3180_v53, 0.0  ;;  %v2370_v25 = vmul.f32 0.01, %v3180_v53 }
 0x270   : > { %vm2365_vm4 = vcmp.gt.f32.partialorder %v3179_v20, 0.0  ;;  %v2369_v43 = vmul.f32 0.01, %v3179_v20  ;;  %vm2367_vm5 = vcmp.gt.f32.partialorder %v3181_v21, 0.0  ;;  %v2371_v27 = vmul.f32 0.01, %v3181_v21 }
 0x271   : > { %v2372_v14 = vsel %vm2364_vm2, %v3178_v17, %v2368_v24  ;;  %v2374_v29 = vsel %vm2366_vm3, %v3180_v53, %v2370_v25  ;;  %v2157_v30 = vpop.f32.mrb[3].mxu0  ;;  %v2362_v31 = vpop.f32.mrb[3].mxu1 }
 0x272   : > { %v2373_v32 = vsel %vm2365_vm4, %v3179_v20, %v2369_v43  ;;  %v2375_v16 = vsel %vm2367_vm5, %v3181_v21, %v2371_v27  ;;  %v2445_v35 = vpack.c.bf16 %v2372_v14, %v2372_v14  ;;  %v2447_v28 = vpack.c.bf16 %v2374_v29, %v2374_v29 }
 0x273   : > { %v2446_v33 = vpack.c.bf16 %v2373_v32, %v2373_v32  ;;  %v2448_v34 = vpack.c.bf16 %v2375_v16, %v2375_v16 }
 0x275   : > { %2673 = vmatprep.mubr.bf16.mxu0 %v2446_v33  ;;  %2713 = vmatprep.mubr.bf16.mxu1 %v2448_v34 }
 0x276   : > { %2674 = vmatmul.mubr.bf16.vlgmr.msra.gmra.mrb[4].mxu0 %v2445_v35  ;;  %2714 = vmatmul.mubr.bf16.vlgmr.msra.gmra.mrb[4].mxu1 %v2447_v28 }
 0x349   : > { %v3150_v36 = vpop.f32.mrb[4].mxu0  ;;  %v3172_v26 = vpop.f32.mrb[4].mxu1 }
 0x34a   : > { %v3151_v37 = vpop.f32.mrb[5].mxu0  ;;  %v3173_v38 = vpop.f32.mrb[5].mxu1 }
 0x34b   : > { %v3152_v39 = vadd.f32 %v3151_v37, %v3150_v36  ;;  %v3174_v40 = vadd.f32 %v3173_v38, %v3172_v26  ;;  %v3153_v41 = vpop.f32.mrb[6].mxu0  ;;  %v3175_v50 = vpop.f32.mrb[6].mxu1 }
 0x34c   : > { %v3154_v42 = vpop.f32.mrb[7].mxu0  ;;  %v3176_v44 = vpop.f32.mrb[7].mxu1 }
 0x34d   : > { %v2716_v46 = vadd.f32 %v3174_v40, %v3152_v39 }
 0x34f   : > { %v2721_v47 = vadd.f32 %v2716_v46, %v2444_v45 }
 0x351   : > { %2723 = vst.msk [vmem:[#allocation10] sm:$0x3] %vm2722_vm6, %v2721_v47 }
 0x352   : > { %3848 = shalt.err (!%p3845_p0)
}
 0x353   : > { %s3849_s13 = scalar_lea.hbm %s4537_s5, 32 }
 0x354   : > { %p3850_p2 = scmp.ne.s32.totalorder %s4537_s5, %s3849_s13  ;;  %p3855_p6 = scmp.lt.u32.totalorder %s3849_s13, %s4537_s5 }
 0x356   : > { %p3851_p3 = pnand %p3850_p2, %p3256_p12 }
 0x358   : > { %p3852_p4 = pneg %p3851_p3 }
 0x35a   : > { %p3857_p7 = pnand %p3855_p6, %p3852_p4 }
 0x35c   : > { %3860 = shalt.err (!%p3857_p7)
}
 0x35d   : > { %3232 = dma.vmem_to_hbm [thread:$0]  (%p3256_p12), %s2732_s27, 32, %s4537_s5, [#allocation4]  }
 0x35e   : > { %3894 = dma.done.wait (%p3256_p12), [#allocation4], 32  }
 0x35f   : > { %3896 = vsyncadd (%p3256_p12), [#allocation4], 4294967264 }
 0x360 PF: > { %p18_p11 = scmp.ge.s32.totalorder %s3974_s23, 4   ;;  %s4558_s18 = smov %s3903_s19 }
 0x361   : > { %s4559_s19 = smov %s3907_s20  ;;  %s4560_s20 = smov %s3984_s26 }
 0x362   : > { %s4561_s21 = smov %s3974_s23  ;;  %20 = sbr.rel (!%p18_p11) target bundleno = 6 (0x6), region = 96 }
 0x369   :  { %2744 = vsyncpa [#allocation3], 1 }
 0x36a   :  { %2746 = vsyncpa [#allocation3 + $0x1], 1 }
 0x36b   :  { %2747 = vsyncpa [#allocation6], 1 }
 0x36c   :  { %2749 = vsyncpa [#allocation6 + $0x1], 1 }
 0x36d   :  { %2750 = vsyncpa [#allocation9], 1 }
 0x36e   :  { %2751 = vsyncpa [#allocation4], 1 }
 0x36f   :  { %2753 = vsyncpa [#allocation4 + $0x1], 1 }

</bundles_post_ra>
